<compile_context>
chip_gen: v6e
topology: v6e:2x2x1
jax: 0.10.0
libtpu: 0.0.40
codegen_flags: <defaults>
</compile_context>

<pallas_src>
import functools

import jax
import jax.numpy as jnp
from jax.experimental import pallas as pl
from jax.experimental.pallas import tpu as pltpu

LANES = 128
SUBLANES = 8
# MXU operand dtype for the F->F convs. f32 accumulation via preferred_element_type.
MM_DTYPE = jnp.bfloat16


def _round_up(x, m):
    return (x + m - 1) // m * m


def _pad_lane(a, target, axis):
    pad = target - a.shape[axis]
    if pad <= 0:
        return a
    widths = [(0, 0)] * a.ndim
    widths[axis] = (0, pad)
    return jnp.pad(a, widths)


# ----------------------------------------------------------------------------
# Fused Pallas kernel: one batch element per grid step, feature stays in VMEM.
# ----------------------------------------------------------------------------
def _fused_stage_kernel(x_ref, m_ref, w_in_ref, b_in_ref, wd_ref, bd_ref,
                        w1_ref, b1_ref, w_out_ref, b_out_ref,
                        o_ref, feat_ref, *, T, K, dilations, paddings,
                        valid_off, n_cls):
    mm = MM_DTYPE
    Tp, Cp = feat_ref.shape
    num_layers = len(dilations)

    # Hoisted mask broadcast: (T, 1) -> (T, Cp), reused by every layer + output.
    mask_b = jnp.broadcast_to(m_ref[0], (T, Cp))                 # f32

    # ---- zero only the halo rows of the resident feature scratch -----------
    head = valid_off
    tail = Tp - (valid_off + T)
    if head > 0:
        feat_ref[pl.ds(0, head), :] = jnp.zeros((head, Cp), feat_ref.dtype)
    if tail > 0:
        feat_ref[pl.ds(valid_off + T, tail), :] = jnp.zeros((tail, Cp),
                                                            feat_ref.dtype)

    # ---- input 1x1 conv (f32 operands; unmasked, matching PyTorch) ---------
    feat_val = jnp.dot(x_ref[0], w_in_ref[...],
                       preferred_element_type=jnp.float32) + b_in_ref[...]
    feat_ref[pl.ds(valid_off, T), :] = feat_val.astype(feat_ref.dtype)

    # ---- dilated residual layers (statically unrolled) ----------------------
    for i, (d, p) in enumerate(zip(dilations, paddings)):
        # K separate MXU matmuls on shifted bf16 taps, accumulated in f32.
        h = jnp.dot(feat_ref[pl.ds(valid_off - p, T), :], wd_ref[i, 0],
                    preferred_element_type=jnp.float32)
        for k in range(1, K):
            h = h + jnp.dot(feat_ref[pl.ds(valid_off - p + k * d, T), :],
                            wd_ref[i, k], preferred_element_type=jnp.float32)
        h = jnp.maximum(h + bd_ref[i], 0.0)                      # bias + ReLU (f32)
        h = jnp.dot(h.astype(mm), w1_ref[i],
                    preferred_element_type=jnp.float32) + b1_ref[i]
        # nn.Dropout() is the identity at inference time.
        feat_val = (feat_val + h) * mask_b
        if i < num_layers - 1:       # nothing reads the scratch after the last layer
            feat_ref[pl.ds(valid_off, T), :] = feat_val.astype(feat_ref.dtype)

    # ---- output 1x1 conv + mask; narrow (T, n_cls) store --------------------
    out = jnp.dot(feat_val.astype(mm), w_out_ref[...],
                  preferred_element_type=jnp.float32)
    out = (out + b_out_ref[...]) * mask_b
    o_ref[0] = out[:, :n_cls].astype(o_ref.dtype)


# ----------------------------------------------------------------------------
# Parameter construction (f32 "PyTorch-like" params) and Pallas-side packing.
# ----------------------------------------------------------------------------
def make_params(key, *, exponential_boundary, deta_dilation, kernel_size,
                num_layers, num_f_maps, dim, num_classes):
    def dense(key, cin, cout):
        kw, kb = jax.random.split(key)
        scale = 1.0 / jnp.sqrt(cin)
        w = jax.random.uniform(kw, (cin, cout), jnp.float32, -scale, scale)
        b = jax.random.uniform(kb, (1, cout), jnp.float32, -scale, scale)
        return w, b

    keys = jax.random.split(key, 2 + num_layers)
    w_in, b_in = dense(keys[0], dim, num_f_maps)
    w_out, b_out = dense(keys[1], num_f_maps, num_classes)

    layers = []
    for i in range(num_layers):
        if i <= exponential_boundary:
            dilation = 2 ** i
        else:
            dilation = 2 ** exponential_boundary + i * deta_dilation
        padding = (kernel_size + (kernel_size - 1) * (dilation - 1) - 1) // 2
        kd, k1 = jax.random.split(keys[2 + i])
        scale = 1.0 / jnp.sqrt(num_f_maps * kernel_size)
        kdw, kdb = jax.random.split(kd)
        w_dil = jax.random.uniform(
            kdw, (kernel_size, num_f_maps, num_f_maps), jnp.float32, -scale, scale)
        b_dil = jax.random.uniform(kdb, (1, num_f_maps), jnp.float32, -scale, scale)
        w_1x1, b_1x1 = dense(k1, num_f_maps, num_f_maps)
        layers.append(dict(dilation=dilation, padding=padding,
                           w_dil=w_dil, b_dil=b_dil, w_1x1=w_1x1, b_1x1=b_1x1))

    return dict(w_in=w_in, b_in=b_in, w_out=w_out, b_out=b_out, layers=layers,
                kernel_size=kernel_size)


def prepare_pallas_params(params):
    """Pad F/class dims to 128 lanes, cast F->F matmul operands to MM_DTYPE,
    and stack per-layer weights as (L, K, Cp, Cp) for a single DMA each."""
    K = params["kernel_size"]
    dim, F = params["w_in"].shape
    n_cls = params["w_out"].shape[1]
    Cp = _round_up(max(F, n_cls), LANES)

    wd, bd, w1, b1, dilations, paddings = [], [], [], [], [], []
    for lp in params["layers"]:
        wd.append(_pad_lane(_pad_lane(lp["w_dil"], Cp, 1), Cp, 2))   # (K, Cp, Cp)
        bd.append(_pad_lane(lp["b_dil"], Cp, 1))                     # (1, Cp)
        w1.append(_pad_lane(_pad_lane(lp["w_1x1"], Cp, 0), Cp, 1))
        b1.append(_pad_lane(lp["b_1x1"], Cp, 1))
        dilations.append(int(lp["dilation"]))
        paddings.append(int(lp["padding"]))

    return dict(
        Cp=Cp, K=K, dim=dim, n_cls=n_cls,
        dilations=tuple(dilations), paddings=tuple(paddings),
        # Input conv stays f32 (x is shipped unquantized; contraction dim = dim).
        w_in=_pad_lane(params["w_in"], Cp, 1),                       # (dim, Cp) f32
        b_in=_pad_lane(params["b_in"], Cp, 1),
        w_out=_pad_lane(_pad_lane(params["w_out"], Cp, 0), Cp, 1).astype(MM_DTYPE),
        b_out=_pad_lane(params["b_out"], Cp, 1),
        w_dil=jnp.stack(wd).astype(MM_DTYPE),                        # (L, K, Cp, Cp)
        b_dil=jnp.stack(bd),                                         # (L, 1, Cp)
        w_1x1=jnp.stack(w1).astype(MM_DTYPE),                        # (L, Cp, Cp)
        b_1x1=jnp.stack(b1),                                         # (L, 1, Cp)
    )


def single_stage_forward(x_ntc, mask_nt1, pp):
    """x_ntc: (N, T, dim) f32, mask_nt1: (N, T, 1). Returns (N, T, num_classes)."""
    N, T, dim = x_ntc.shape
    Cp, K, n_cls = pp["Cp"], pp["K"], pp["n_cls"]
    L = pp["w_dil"].shape[0]
    dilations, paddings = pp["dilations"], pp["paddings"]
    pmax = max(paddings)

    # bf16 scratch: keep the valid rows aligned to the 16-row packed sublane tile.
    align = 2 * SUBLANES
    valid_off = _round_up(pmax, align)                 # data start (zero halo above)
    Tp = _round_up(valid_off + T + pmax + 1, align)    # scratch rows incl. halos

    mask = mask_nt1.astype(jnp.float32)

    kern = functools.partial(
        _fused_stage_kernel, T=T, K=K, dilations=dilations, paddings=paddings,
        valid_off=valid_off, n_cls=n_cls)

    # Explicit scoped-VMEM budget: resident scratch + double-buffered IO/weights.
    vmem_bytes = (
        Tp * Cp * 2                                          # bf16 feature scratch
        + 2 * (T * dim * 4 + T * 4 + T * n_cls * 4)          # x, mask, out blocks
        + 2 * (dim * Cp * 4 + Cp * 4                         # w_in, b_in
               + L * K * Cp * Cp * 2 + L * Cp * 4            # w_dil, b_dil
               + L * Cp * Cp * 2 + L * Cp * 4                # w_1x1, b_1x1
               + Cp * Cp * 2 + Cp * 4))                      # w_out, b_out
    vmem_limit = int(min(vmem_bytes + (16 << 20), 64 << 20))

    out = pl.pallas_call(
        kern,
        out_shape=jax.ShapeDtypeStruct((N, T, n_cls), jnp.float32),
        grid=(N,),
        in_specs=[
            pl.BlockSpec((1, T, dim), lambda n: (n, 0, 0)),          # x (f32, unpadded)
            pl.BlockSpec((1, T, 1), lambda n: (n, 0, 0)),            # mask
            pl.BlockSpec((dim, Cp), lambda n: (0, 0)),               # w_in (f32)
            pl.BlockSpec((1, Cp), lambda n: (0, 0)),                 # b_in
            pl.BlockSpec((L, K, Cp, Cp), lambda n: (0, 0, 0, 0)),    # w_dil (stacked)
            pl.BlockSpec((L, 1, Cp), lambda n: (0, 0, 0)),           # b_dil
            pl.BlockSpec((L, Cp, Cp), lambda n: (0, 0, 0)),          # w_1x1
            pl.BlockSpec((L, 1, Cp), lambda n: (0, 0, 0)),           # b_1x1
            pl.BlockSpec((Cp, Cp), lambda n: (0, 0)),                # w_out
            pl.BlockSpec((1, Cp), lambda n: (0, 0)),                 # b_out
        ],
        out_specs=pl.BlockSpec((1, T, n_cls), lambda n: (n, 0, 0)),  # narrow store
        scratch_shapes=[pltpu.VMEM((Tp, Cp), MM_DTYPE)],             # resident feature
        compiler_params=pltpu.CompilerParams(
            dimension_semantics=("parallel",),
            vmem_limit_bytes=vmem_limit),
    )(x_ntc.astype(jnp.float32), mask, pp["w_in"], pp["b_in"],
      pp["w_dil"], pp["b_dil"], pp["w_1x1"], pp["b_1x1"],
      pp["w_out"], pp["b_out"])

    return out


# ----------------------------------------------------------------------------
# Pure-JAX f32 reference for correctness checking.
# ----------------------------------------------------------------------------
def reference_forward(x_ntc, mask_nt1, params):
    T = x_ntc.shape[1]
    K = params["kernel_size"]

    def pconv(x, w, b):
        return jnp.einsum("ntc,cd->ntd", x, w) + b[0]

    feat = pconv(x_ntc, params["w_in"], params["b_in"])
    for lp in params["layers"]:
        d, p = lp["dilation"], lp["padding"]
        xp = jnp.pad(feat, ((0, 0), (p, p), (0, 0)))
        acc = lp["b_dil"][0]
        for k in range(K):
            acc = acc + jnp.einsum("ntc,cd->ntd",
                                   xp[:, k * d: k * d + T, :], lp["w_dil"][k])
        h = jax.nn.relu(acc)
        h = jnp.einsum("ntc,cd->ntd", h, lp["w_1x1"]) + lp["b_1x1"][0]
        feat = (feat + h) * mask_nt1
    return pconv(feat, params["w_out"], params["b_out"]) * mask_nt1


# ----------------------------------------------------------------------------
if __name__ == "__main__":
    # Module hyper-parameters (small synthetic config).
    exponential_boundary = 2
    deta_dilation = 1
    kernel_size = 3
    num_layers = 4          # dilations: 1, 2, 4, 7
    num_f_maps = 32
    dim = 24
    num_classes = 8

    N, T = 2, 16            # PyTorch input x would be (N, dim, T) = (2, 24, 16)

    key = jax.random.PRNGKey(0)
    kx, kp = jax.random.split(key)

    params = make_params(
        kp, exponential_boundary=exponential_boundary, deta_dilation=deta_dilation,
        kernel_size=kernel_size, num_layers=num_layers, num_f_maps=num_f_maps,
        dim=dim, num_classes=num_classes)
    pallas_params = prepare_pallas_params(params)

    # Inputs in channels-last layout (N, T, C).
    x_ntc = jax.random.normal(kx, (N, T, dim), dtype=jnp.float32)
    # Sequence-style mask: batch 0 fully valid, batch 1 valid for first 12 steps.
    valid_len = jnp.array([T, 12])
    mask_nt1 = (jnp.arange(T)[None, :] < valid_len[:, None]).astype(jnp.float32)
    mask_nt1 = mask_nt1[:, :, None]                       # (N, T, 1)

    out = single_stage_forward(x_ntc, mask_nt1, pallas_params)
    out = jax.block_until_ready(out)

    ref = reference_forward(x_ntc, mask_nt1, params)
    assert out.shape == (N, T, num_classes)
    tol = 5e-2 if MM_DTYPE == jnp.bfloat16 else 1e-4   # bf16 MXU operands, f32 accum
    assert jnp.allclose(out, ref, atol=tol, rtol=tol), "Pallas / reference mismatch"

    print("KERNEL_OK")
</pallas_src>

<mosaic_0001>
module attributes {stable_mosaic.version = 11 : i64} {
  func.func @_fused_stage_kernel(%arg0: i32, %arg1: memref<1x16x24xf32, #tpu.memory_space<vmem>>, %arg2: memref<1x16x1xf32, #tpu.memory_space<vmem>>, %arg3: memref<24x128xf32, #tpu.memory_space<vmem>>, %arg4: memref<1x128xf32, #tpu.memory_space<vmem>>, %arg5: memref<4x3x128x128xbf16, #tpu.memory_space<vmem>>, %arg6: memref<4x1x128xf32, #tpu.memory_space<vmem>>, %arg7: memref<4x128x128xbf16, #tpu.memory_space<vmem>>, %arg8: memref<4x1x128xf32, #tpu.memory_space<vmem>>, %arg9: memref<128x128xbf16, #tpu.memory_space<vmem>>, %arg10: memref<1x128xf32, #tpu.memory_space<vmem>>, %arg11: memref<1x16x8xf32, #tpu.memory_space<vmem>>, %arg12: memref<48x128xbf16, #tpu.memory_space<vmem>>) attributes {dimension_semantics = [#tpu.dimension_semantics<parallel>], iteration_bounds = array<i64: 2>, scalar_prefetch = 0 : i64, scratch_operands = 1 : i64, tpu.core_type = #tpu.core_type<tc>, window_params = [{transform_indices = @transform_0, window_bounds = array<i64: 1, 16, 24>}, {transform_indices = @transform_1, window_bounds = array<i64: 1, 16, 1>}, {pipeline_mode = #tpu.pipeline_mode<synchronous>, transform_indices = @transform_2, window_bounds = array<i64: 24, 128>}, {pipeline_mode = #tpu.pipeline_mode<synchronous>, transform_indices = @transform_3, window_bounds = array<i64: 1, 128>}, {pipeline_mode = #tpu.pipeline_mode<synchronous>, transform_indices = @transform_4, window_bounds = array<i64: 4, 3, 128, 128>}, {pipeline_mode = #tpu.pipeline_mode<synchronous>, transform_indices = @transform_5, window_bounds = array<i64: 4, 1, 128>}, {pipeline_mode = #tpu.pipeline_mode<synchronous>, transform_indices = @transform_6, window_bounds = array<i64: 4, 128, 128>}, {pipeline_mode = #tpu.pipeline_mode<synchronous>, transform_indices = @transform_7, window_bounds = array<i64: 4, 1, 128>}, {pipeline_mode = #tpu.pipeline_mode<synchronous>, transform_indices = @transform_8, window_bounds = array<i64: 128, 128>}, {pipeline_mode = #tpu.pipeline_mode<synchronous>, transform_indices = @transform_9, window_bounds = array<i64: 1, 128>}, {transform_indices = @transform_10, window_bounds = array<i64: 1, 16, 8>}]} {
    %c0 = arith.constant 0 : index
    %c0_0 = arith.constant 0 : index
    %c0_1 = arith.constant 0 : index
    %0 = vector.load %arg2[%c0, %c0_0, %c0_1] : memref<1x16x1xf32, #tpu.memory_space<vmem>>, vector<1x16x1xf32>
    %1 = vector.shape_cast %0 : vector<1x16x1xf32> to vector<16x1xf32>
    %2 = vector.shape_cast %1 : vector<16x1xf32> to vector<16x1xf32>
    %3 = vector.broadcast %2 : vector<16x1xf32> to vector<16x128xf32>
    %cst = arith.constant 0.000000e+00 : bf16
    %4 = vector.broadcast %cst : bf16 to vector<16x128xbf16>
    %c0_2 = arith.constant 0 : index
    %c0_3 = arith.constant 0 : index
    %5 = vector.load %arg12[%c0_2, %c0_3] : memref<48x128xbf16, #tpu.memory_space<vmem>>, vector<16x128xbf16>
    tpu.vector_store %arg12[%c0_2, %c0_3], %4 {strides = array<i32>} : memref<48x128xbf16, #tpu.memory_space<vmem>>, vector<16x128xbf16>,
    %cst_4 = arith.constant 0.000000e+00 : bf16
    %6 = vector.broadcast %cst_4 : bf16 to vector<16x128xbf16>
    %c32 = arith.constant 32 : index
    %c0_5 = arith.constant 0 : index
    %7 = vector.load %arg12[%c32, %c0_5] : memref<48x128xbf16, #tpu.memory_space<vmem>>, vector<16x128xbf16>
    tpu.vector_store %arg12[%c32, %c0_5], %6 {strides = array<i32>} : memref<48x128xbf16, #tpu.memory_space<vmem>>, vector<16x128xbf16>,
    %c0_6 = arith.constant 0 : index
    %c0_7 = arith.constant 0 : index
    %c0_8 = arith.constant 0 : index
    %8 = vector.load %arg1[%c0_6, %c0_7, %c0_8] : memref<1x16x24xf32, #tpu.memory_space<vmem>>, vector<1x16x24xf32>
    %9 = vector.shape_cast %8 : vector<1x16x24xf32> to vector<16x24xf32>
    %c0_9 = arith.constant 0 : index
    %c0_10 = arith.constant 0 : index
    %10 = vector.load %arg3[%c0_9, %c0_10] : memref<24x128xf32, #tpu.memory_space<vmem>>, vector<24x128xf32>
    %cst_11 = arith.constant dense<0.000000e+00> : vector<16x128xf32>
    %11 = tpu.matmul %9, %10, %cst_11 {dimension_numbers = #tpu.dot_dimension_numbers<[1], [0], [0], [1], [0, 0, 1, 1], [], []>} : vector<16x24xf32>, vector<24x128xf32>, vector<16x128xf32> -> vector<16x128xf32>
    %c0_12 = arith.constant 0 : index
    %c0_13 = arith.constant 0 : index
    %12 = vector.load %arg4[%c0_12, %c0_13] : memref<1x128xf32, #tpu.memory_space<vmem>>, vector<1x128xf32>
    %13 = vector.broadcast %12 : vector<1x128xf32> to vector<16x128xf32>
    %14 = arith.addf %11, %13 : vector<16x128xf32>
    %15 = arith.truncf %14 : vector<16x128xf32> to vector<16x128xbf16>
    %c16 = arith.constant 16 : index
    %c0_14 = arith.constant 0 : index
    %16 = vector.load %arg12[%c16, %c0_14] : memref<48x128xbf16, #tpu.memory_space<vmem>>, vector<16x128xbf16>
    tpu.vector_store %arg12[%c16, %c0_14], %15 {strides = array<i32>} : memref<48x128xbf16, #tpu.memory_space<vmem>>, vector<16x128xbf16>,
    %c15 = arith.constant 15 : index
    %c0_15 = arith.constant 0 : index
    %17 = vector.load %arg12[%c15, %c0_15] : memref<48x128xbf16, #tpu.memory_space<vmem>>, vector<16x128xbf16>
    %c0_16 = arith.constant 0 : index
    %c0_17 = arith.constant 0 : index
    %c0_18 = arith.constant 0 : index
    %c0_19 = arith.constant 0 : index
    %18 = vector.load %arg5[%c0_16, %c0_17, %c0_18, %c0_19] : memref<4x3x128x128xbf16, #tpu.memory_space<vmem>>, vector<1x1x128x128xbf16>
    %19 = vector.shape_cast %18 : vector<1x1x128x128xbf16> to vector<128x128xbf16>
    %cst_20 = arith.constant dense<0.000000e+00> : vector<16x128xf32>
    %20 = tpu.matmul %17, %19, %cst_20 {dimension_numbers = #tpu.dot_dimension_numbers<[1], [0], [0], [1], [0, 0, 1, 1], [], []>} : vector<16x128xbf16>, vector<128x128xbf16>, vector<16x128xf32> -> vector<16x128xf32>
    %c16_21 = arith.constant 16 : index
    %c0_22 = arith.constant 0 : index
    %21 = vector.load %arg12[%c16_21, %c0_22] : memref<48x128xbf16, #tpu.memory_space<vmem>>, vector<16x128xbf16>
    %c0_23 = arith.constant 0 : index
    %c1 = arith.constant 1 : index
    %c0_24 = arith.constant 0 : index
    %c0_25 = arith.constant 0 : index
    %22 = vector.load %arg5[%c0_23, %c1, %c0_24, %c0_25] : memref<4x3x128x128xbf16, #tpu.memory_space<vmem>>, vector<1x1x128x128xbf16>
    %23 = vector.shape_cast %22 : vector<1x1x128x128xbf16> to vector<128x128xbf16>
    %cst_26 = arith.constant dense<0.000000e+00> : vector<16x128xf32>
    %24 = tpu.matmul %21, %23, %cst_26 {dimension_numbers = #tpu.dot_dimension_numbers<[1], [0], [0], [1], [0, 0, 1, 1], [], []>} : vector<16x128xbf16>, vector<128x128xbf16>, vector<16x128xf32> -> vector<16x128xf32>
    %25 = arith.addf %20, %24 : vector<16x128xf32>
    %c17 = arith.constant 17 : index
    %c0_27 = arith.constant 0 : index
    %26 = vector.load %arg12[%c17, %c0_27] : memref<48x128xbf16, #tpu.memory_space<vmem>>, vector<16x128xbf16>
    %c0_28 = arith.constant 0 : index
    %c2 = arith.constant 2 : index
    %c0_29 = arith.constant 0 : index
    %c0_30 = arith.constant 0 : index
    %27 = vector.load %arg5[%c0_28, %c2, %c0_29, %c0_30] : memref<4x3x128x128xbf16, #tpu.memory_space<vmem>>, vector<1x1x128x128xbf16>
    %28 = vector.shape_cast %27 : vector<1x1x128x128xbf16> to vector<128x128xbf16>
    %cst_31 = arith.constant dense<0.000000e+00> : vector<16x128xf32>
    %29 = tpu.matmul %26, %28, %cst_31 {dimension_numbers = #tpu.dot_dimension_numbers<[1], [0], [0], [1], [0, 0, 1, 1], [], []>} : vector<16x128xbf16>, vector<128x128xbf16>, vector<16x128xf32> -> vector<16x128xf32>
    %30 = arith.addf %25, %29 : vector<16x128xf32>
    %c0_32 = arith.constant 0 : index
    %c0_33 = arith.constant 0 : index
    %c0_34 = arith.constant 0 : index
    %31 = vector.load %arg6[%c0_32, %c0_33, %c0_34] : memref<4x1x128xf32, #tpu.memory_space<vmem>>, vector<1x1x128xf32>
    %32 = vector.shape_cast %31 : vector<1x1x128xf32> to vector<1x128xf32>
    %33 = vector.broadcast %32 : vector<1x128xf32> to vector<16x128xf32>
    %34 = arith.addf %30, %33 : vector<16x128xf32>
    %cst_35 = arith.constant 0.000000e+00 : f32
    %35 = vector.broadcast %cst_35 : f32 to vector<16x128xf32>
    %36 = arith.maximumf %34, %35 : vector<16x128xf32>
    %37 = arith.truncf %36 : vector<16x128xf32> to vector<16x128xbf16>
    %c0_36 = arith.constant 0 : index
    %c0_37 = arith.constant 0 : index
    %c0_38 = arith.constant 0 : index
    %38 = vector.load %arg7[%c0_36, %c0_37, %c0_38] : memref<4x128x128xbf16, #tpu.memory_space<vmem>>, vector<1x128x128xbf16>
    %39 = vector.shape_cast %38 : vector<1x128x128xbf16> to vector<128x128xbf16>
    %cst_39 = arith.constant dense<0.000000e+00> : vector<16x128xf32>
    %40 = tpu.matmul %37, %39, %cst_39 {dimension_numbers = #tpu.dot_dimension_numbers<[1], [0], [0], [1], [0, 0, 1, 1], [], []>} : vector<16x128xbf16>, vector<128x128xbf16>, vector<16x128xf32> -> vector<16x128xf32>
    %c0_40 = arith.constant 0 : index
    %c0_41 = arith.constant 0 : index
    %c0_42 = arith.constant 0 : index
    %41 = vector.load %arg8[%c0_40, %c0_41, %c0_42] : memref<4x1x128xf32, #tpu.memory_space<vmem>>, vector<1x1x128xf32>
    %42 = vector.shape_cast %41 : vector<1x1x128xf32> to vector<1x128xf32>
    %43 = vector.broadcast %42 : vector<1x128xf32> to vector<16x128xf32>
    %44 = arith.addf %40, %43 : vector<16x128xf32>
    %45 = arith.addf %14, %44 : vector<16x128xf32>
    %46 = arith.mulf %45, %3 : vector<16x128xf32>
    %47 = arith.truncf %46 : vector<16x128xf32> to vector<16x128xbf16>
    %c16_43 = arith.constant 16 : index
    %c0_44 = arith.constant 0 : index
    %48 = vector.load %arg12[%c16_43, %c0_44] : memref<48x128xbf16, #tpu.memory_space<vmem>>, vector<16x128xbf16>
    tpu.vector_store %arg12[%c16_43, %c0_44], %47 {strides = array<i32>} : memref<48x128xbf16, #tpu.memory_space<vmem>>, vector<16x128xbf16>,
    %c14 = arith.constant 14 : index
    %c0_45 = arith.constant 0 : index
    %49 = vector.load %arg12[%c14, %c0_45] : memref<48x128xbf16, #tpu.memory_space<vmem>>, vector<16x128xbf16>
    %c1_46 = arith.constant 1 : index
    %c0_47 = arith.constant 0 : index
    %c0_48 = arith.constant 0 : index
    %c0_49 = arith.constant 0 : index
    %50 = vector.load %arg5[%c1_46, %c0_47, %c0_48, %c0_49] : memref<4x3x128x128xbf16, #tpu.memory_space<vmem>>, vector<1x1x128x128xbf16>
    %51 = vector.shape_cast %50 : vector<1x1x128x128xbf16> to vector<128x128xbf16>
    %cst_50 = arith.constant dense<0.000000e+00> : vector<16x128xf32>
    %52 = tpu.matmul %49, %51, %cst_50 {dimension_numbers = #tpu.dot_dimension_numbers<[1], [0], [0], [1], [0, 0, 1, 1], [], []>} : vector<16x128xbf16>, vector<128x128xbf16>, vector<16x128xf32> -> vector<16x128xf32>
    %c16_51 = arith.constant 16 : index
    %c0_52 = arith.constant 0 : index
    %53 = vector.load %arg12[%c16_51, %c0_52] : memref<48x128xbf16, #tpu.memory_space<vmem>>, vector<16x128xbf16>
    %c1_53 = arith.constant 1 : index
    %c1_54 = arith.constant 1 : index
    %c0_55 = arith.constant 0 : index
    %c0_56 = arith.constant 0 : index
    %54 = vector.load %arg5[%c1_53, %c1_54, %c0_55, %c0_56] : memref<4x3x128x128xbf16, #tpu.memory_space<vmem>>, vector<1x1x128x128xbf16>
    %55 = vector.shape_cast %54 : vector<1x1x128x128xbf16> to vector<128x128xbf16>
    %cst_57 = arith.constant dense<0.000000e+00> : vector<16x128xf32>
    %56 = tpu.matmul %53, %55, %cst_57 {dimension_numbers = #tpu.dot_dimension_numbers<[1], [0], [0], [1], [0, 0, 1, 1], [], []>} : vector<16x128xbf16>, vector<128x128xbf16>, vector<16x128xf32> -> vector<16x128xf32>
    %57 = arith.addf %52, %56 : vector<16x128xf32>
    %c18 = arith.constant 18 : index
    %c0_58 = arith.constant 0 : index
    %58 = vector.load %arg12[%c18, %c0_58] : memref<48x128xbf16, #tpu.memory_space<vmem>>, vector<16x128xbf16>
    %c1_59 = arith.constant 1 : index
    %c2_60 = arith.constant 2 : index
    %c0_61 = arith.constant 0 : index
    %c0_62 = arith.constant 0 : index
    %59 = vector.load %arg5[%c1_59, %c2_60, %c0_61, %c0_62] : memref<4x3x128x128xbf16, #tpu.memory_space<vmem>>, vector<1x1x128x128xbf16>
    %60 = vector.shape_cast %59 : vector<1x1x128x128xbf16> to vector<128x128xbf16>
    %cst_63 = arith.constant dense<0.000000e+00> : vector<16x128xf32>
    %61 = tpu.matmul %58, %60, %cst_63 {dimension_numbers = #tpu.dot_dimension_numbers<[1], [0], [0], [1], [0, 0, 1, 1], [], []>} : vector<16x128xbf16>, vector<128x128xbf16>, vector<16x128xf32> -> vector<16x128xf32>
    %62 = arith.addf %57, %61 : vector<16x128xf32>
    %c1_64 = arith.constant 1 : index
    %c0_65 = arith.constant 0 : index
    %c0_66 = arith.constant 0 : index
    %63 = vector.load %arg6[%c1_64, %c0_65, %c0_66] : memref<4x1x128xf32, #tpu.memory_space<vmem>>, vector<1x1x128xf32>
    %64 = vector.shape_cast %63 : vector<1x1x128xf32> to vector<1x128xf32>
    %65 = vector.broadcast %64 : vector<1x128xf32> to vector<16x128xf32>
    %66 = arith.addf %62, %65 : vector<16x128xf32>
    %cst_67 = arith.constant 0.000000e+00 : f32
    %67 = vector.broadcast %cst_67 : f32 to vector<16x128xf32>
    %68 = arith.maximumf %66, %67 : vector<16x128xf32>
    %69 = arith.truncf %68 : vector<16x128xf32> to vector<16x128xbf16>
    %c1_68 = arith.constant 1 : index
    %c0_69 = arith.constant 0 : index
    %c0_70 = arith.constant 0 : index
    %70 = vector.load %arg7[%c1_68, %c0_69, %c0_70] : memref<4x128x128xbf16, #tpu.memory_space<vmem>>, vector<1x128x128xbf16>
    %71 = vector.shape_cast %70 : vector<1x128x128xbf16> to vector<128x128xbf16>
    %cst_71 = arith.constant dense<0.000000e+00> : vector<16x128xf32>
    %72 = tpu.matmul %69, %71, %cst_71 {dimension_numbers = #tpu.dot_dimension_numbers<[1], [0], [0], [1], [0, 0, 1, 1], [], []>} : vector<16x128xbf16>, vector<128x128xbf16>, vector<16x128xf32> -> vector<16x128xf32>
    %c1_72 = arith.constant 1 : index
    %c0_73 = arith.constant 0 : index
    %c0_74 = arith.constant 0 : index
    %73 = vector.load %arg8[%c1_72, %c0_73, %c0_74] : memref<4x1x128xf32, #tpu.memory_space<vmem>>, vector<1x1x128xf32>
    %74 = vector.shape_cast %73 : vector<1x1x128xf32> to vector<1x128xf32>
    %75 = vector.broadcast %74 : vector<1x128xf32> to vector<16x128xf32>
    %76 = arith.addf %72, %75 : vector<16x128xf32>
    %77 = arith.addf %46, %76 : vector<16x128xf32>
    %78 = arith.mulf %77, %3 : vector<16x128xf32>
    %79 = arith.truncf %78 : vector<16x128xf32> to vector<16x128xbf16>
    %c16_75 = arith.constant 16 : index
    %c0_76 = arith.constant 0 : index
    %80 = vector.load %arg12[%c16_75, %c0_76] : memref<48x128xbf16, #tpu.memory_space<vmem>>, vector<16x128xbf16>
    tpu.vector_store %arg12[%c16_75, %c0_76], %79 {strides = array<i32>} : memref<48x128xbf16, #tpu.memory_space<vmem>>, vector<16x128xbf16>,
    %c12 = arith.constant 12 : index
    %c0_77 = arith.constant 0 : index
    %81 = vector.load %arg12[%c12, %c0_77] : memref<48x128xbf16, #tpu.memory_space<vmem>>, vector<16x128xbf16>
    %c2_78 = arith.constant 2 : index
    %c0_79 = arith.constant 0 : index
    %c0_80 = arith.constant 0 : index
    %c0_81 = arith.constant 0 : index
    %82 = vector.load %arg5[%c2_78, %c0_79, %c0_80, %c0_81] : memref<4x3x128x128xbf16, #tpu.memory_space<vmem>>, vector<1x1x128x128xbf16>
    %83 = vector.shape_cast %82 : vector<1x1x128x128xbf16> to vector<128x128xbf16>
    %cst_82 = arith.constant dense<0.000000e+00> : vector<16x128xf32>
    %84 = tpu.matmul %81, %83, %cst_82 {dimension_numbers = #tpu.dot_dimension_numbers<[1], [0], [0], [1], [0, 0, 1, 1], [], []>} : vector<16x128xbf16>, vector<128x128xbf16>, vector<16x128xf32> -> vector<16x128xf32>
    %c16_83 = arith.constant 16 : index
    %c0_84 = arith.constant 0 : index
    %85 = vector.load %arg12[%c16_83, %c0_84] : memref<48x128xbf16, #tpu.memory_space<vmem>>, vector<16x128xbf16>
    %c2_85 = arith.constant 2 : index
    %c1_86 = arith.constant 1 : index
    %c0_87 = arith.constant 0 : index
    %c0_88 = arith.constant 0 : index
    %86 = vector.load %arg5[%c2_85, %c1_86, %c0_87, %c0_88] : memref<4x3x128x128xbf16, #tpu.memory_space<vmem>>, vector<1x1x128x128xbf16>
    %87 = vector.shape_cast %86 : vector<1x1x128x128xbf16> to vector<128x128xbf16>
    %cst_89 = arith.constant dense<0.000000e+00> : vector<16x128xf32>
    %88 = tpu.matmul %85, %87, %cst_89 {dimension_numbers = #tpu.dot_dimension_numbers<[1], [0], [0], [1], [0, 0, 1, 1], [], []>} : vector<16x128xbf16>, vector<128x128xbf16>, vector<16x128xf32> -> vector<16x128xf32>
    %89 = arith.addf %84, %88 : vector<16x128xf32>
    %c20 = arith.constant 20 : index
    %c0_90 = arith.constant 0 : index
    %90 = vector.load %arg12[%c20, %c0_90] : memref<48x128xbf16, #tpu.memory_space<vmem>>, vector<16x128xbf16>
    %c2_91 = arith.constant 2 : index
    %c2_92 = arith.constant 2 : index
    %c0_93 = arith.constant 0 : index
    %c0_94 = arith.constant 0 : index
    %91 = vector.load %arg5[%c2_91, %c2_92, %c0_93, %c0_94] : memref<4x3x128x128xbf16, #tpu.memory_space<vmem>>, vector<1x1x128x128xbf16>
    %92 = vector.shape_cast %91 : vector<1x1x128x128xbf16> to vector<128x128xbf16>
    %cst_95 = arith.constant dense<0.000000e+00> : vector<16x128xf32>
    %93 = tpu.matmul %90, %92, %cst_95 {dimension_numbers = #tpu.dot_dimension_numbers<[1], [0], [0], [1], [0, 0, 1, 1], [], []>} : vector<16x128xbf16>, vector<128x128xbf16>, vector<16x128xf32> -> vector<16x128xf32>
    %94 = arith.addf %89, %93 : vector<16x128xf32>
    %c2_96 = arith.constant 2 : index
    %c0_97 = arith.constant 0 : index
    %c0_98 = arith.constant 0 : index
    %95 = vector.load %arg6[%c2_96, %c0_97, %c0_98] : memref<4x1x128xf32, #tpu.memory_space<vmem>>, vector<1x1x128xf32>
    %96 = vector.shape_cast %95 : vector<1x1x128xf32> to vector<1x128xf32>
    %97 = vector.broadcast %96 : vector<1x128xf32> to vector<16x128xf32>
    %98 = arith.addf %94, %97 : vector<16x128xf32>
    %cst_99 = arith.constant 0.000000e+00 : f32
    %99 = vector.broadcast %cst_99 : f32 to vector<16x128xf32>
    %100 = arith.maximumf %98, %99 : vector<16x128xf32>
    %101 = arith.truncf %100 : vector<16x128xf32> to vector<16x128xbf16>
    %c2_100 = arith.constant 2 : index
    %c0_101 = arith.constant 0 : index
    %c0_102 = arith.constant 0 : index
    %102 = vector.load %arg7[%c2_100, %c0_101, %c0_102] : memref<4x128x128xbf16, #tpu.memory_space<vmem>>, vector<1x128x128xbf16>
    %103 = vector.shape_cast %102 : vector<1x128x128xbf16> to vector<128x128xbf16>
    %cst_103 = arith.constant dense<0.000000e+00> : vector<16x128xf32>
    %104 = tpu.matmul %101, %103, %cst_103 {dimension_numbers = #tpu.dot_dimension_numbers<[1], [0], [0], [1], [0, 0, 1, 1], [], []>} : vector<16x128xbf16>, vector<128x128xbf16>, vector<16x128xf32> -> vector<16x128xf32>
    %c2_104 = arith.constant 2 : index
    %c0_105 = arith.constant 0 : index
    %c0_106 = arith.constant 0 : index
    %105 = vector.load %arg8[%c2_104, %c0_105, %c0_106] : memref<4x1x128xf32, #tpu.memory_space<vmem>>, vector<1x1x128xf32>
    %106 = vector.shape_cast %105 : vector<1x1x128xf32> to vector<1x128xf32>
    %107 = vector.broadcast %106 : vector<1x128xf32> to vector<16x128xf32>
    %108 = arith.addf %104, %107 : vector<16x128xf32>
    %109 = arith.addf %78, %108 : vector<16x128xf32>
    %110 = arith.mulf %109, %3 : vector<16x128xf32>
    %111 = arith.truncf %110 : vector<16x128xf32> to vector<16x128xbf16>
    %c16_107 = arith.constant 16 : index
    %c0_108 = arith.constant 0 : index
    %112 = vector.load %arg12[%c16_107, %c0_108] : memref<48x128xbf16, #tpu.memory_space<vmem>>, vector<16x128xbf16>
    tpu.vector_store %arg12[%c16_107, %c0_108], %111 {strides = array<i32>} : memref<48x128xbf16, #tpu.memory_space<vmem>>, vector<16x128xbf16>,
    %c9 = arith.constant 9 : index
    %c0_109 = arith.constant 0 : index
    %113 = vector.load %arg12[%c9, %c0_109] : memref<48x128xbf16, #tpu.memory_space<vmem>>, vector<16x128xbf16>
    %c3 = arith.constant 3 : index
    %c0_110 = arith.constant 0 : index
    %c0_111 = arith.constant 0 : index
    %c0_112 = arith.constant 0 : index
    %114 = vector.load %arg5[%c3, %c0_110, %c0_111, %c0_112] : memref<4x3x128x128xbf16, #tpu.memory_space<vmem>>, vector<1x1x128x128xbf16>
    %115 = vector.shape_cast %114 : vector<1x1x128x128xbf16> to vector<128x128xbf16>
    %cst_113 = arith.constant dense<0.000000e+00> : vector<16x128xf32>
    %116 = tpu.matmul %113, %115, %cst_113 {dimension_numbers = #tpu.dot_dimension_numbers<[1], [0], [0], [1], [0, 0, 1, 1], [], []>} : vector<16x128xbf16>, vector<128x128xbf16>, vector<16x128xf32> -> vector<16x128xf32>
    %c16_114 = arith.constant 16 : index
    %c0_115 = arith.constant 0 : index
    %117 = vector.load %arg12[%c16_114, %c0_115] : memref<48x128xbf16, #tpu.memory_space<vmem>>, vector<16x128xbf16>
    %c3_116 = arith.constant 3 : index
    %c1_117 = arith.constant 1 : index
    %c0_118 = arith.constant 0 : index
    %c0_119 = arith.constant 0 : index
    %118 = vector.load %arg5[%c3_116, %c1_117, %c0_118, %c0_119] : memref<4x3x128x128xbf16, #tpu.memory_space<vmem>>, vector<1x1x128x128xbf16>
    %119 = vector.shape_cast %118 : vector<1x1x128x128xbf16> to vector<128x128xbf16>
    %cst_120 = arith.constant dense<0.000000e+00> : vector<16x128xf32>
    %120 = tpu.matmul %117, %119, %cst_120 {dimension_numbers = #tpu.dot_dimension_numbers<[1], [0], [0], [1], [0, 0, 1, 1], [], []>} : vector<16x128xbf16>, vector<128x128xbf16>, vector<16x128xf32> -> vector<16x128xf32>
    %121 = arith.addf %116, %120 : vector<16x128xf32>
    %c23 = arith.constant 23 : index
    %c0_121 = arith.constant 0 : index
    %122 = vector.load %arg12[%c23, %c0_121] : memref<48x128xbf16, #tpu.memory_space<vmem>>, vector<16x128xbf16>
    %c3_122 = arith.constant 3 : index
    %c2_123 = arith.constant 2 : index
    %c0_124 = arith.constant 0 : index
    %c0_125 = arith.constant 0 : index
    %123 = vector.load %arg5[%c3_122, %c2_123, %c0_124, %c0_125] : memref<4x3x128x128xbf16, #tpu.memory_space<vmem>>, vector<1x1x128x128xbf16>
    %124 = vector.shape_cast %123 : vector<1x1x128x128xbf16> to vector<128x128xbf16>
    %cst_126 = arith.constant dense<0.000000e+00> : vector<16x128xf32>
    %125 = tpu.matmul %122, %124, %cst_126 {dimension_numbers = #tpu.dot_dimension_numbers<[1], [0], [0], [1], [0, 0, 1, 1], [], []>} : vector<16x128xbf16>, vector<128x128xbf16>, vector<16x128xf32> -> vector<16x128xf32>
    %126 = arith.addf %121, %125 : vector<16x128xf32>
    %c3_127 = arith.constant 3 : index
    %c0_128 = arith.constant 0 : index
    %c0_129 = arith.constant 0 : index
    %127 = vector.load %arg6[%c3_127, %c0_128, %c0_129] : memref<4x1x128xf32, #tpu.memory_space<vmem>>, vector<1x1x128xf32>
    %128 = vector.shape_cast %127 : vector<1x1x128xf32> to vector<1x128xf32>
    %129 = vector.broadcast %128 : vector<1x128xf32> to vector<16x128xf32>
    %130 = arith.addf %126, %129 : vector<16x128xf32>
    %cst_130 = arith.constant 0.000000e+00 : f32
    %131 = vector.broadcast %cst_130 : f32 to vector<16x128xf32>
    %132 = arith.maximumf %130, %131 : vector<16x128xf32>
    %133 = arith.truncf %132 : vector<16x128xf32> to vector<16x128xbf16>
    %c3_131 = arith.constant 3 : index
    %c0_132 = arith.constant 0 : index
    %c0_133 = arith.constant 0 : index
    %134 = vector.load %arg7[%c3_131, %c0_132, %c0_133] : memref<4x128x128xbf16, #tpu.memory_space<vmem>>, vector<1x128x128xbf16>
    %135 = vector.shape_cast %134 : vector<1x128x128xbf16> to vector<128x128xbf16>
    %cst_134 = arith.constant dense<0.000000e+00> : vector<16x128xf32>
    %136 = tpu.matmul %133, %135, %cst_134 {dimension_numbers = #tpu.dot_dimension_numbers<[1], [0], [0], [1], [0, 0, 1, 1], [], []>} : vector<16x128xbf16>, vector<128x128xbf16>, vector<16x128xf32> -> vector<16x128xf32>
    %c3_135 = arith.constant 3 : index
    %c0_136 = arith.constant 0 : index
    %c0_137 = arith.constant 0 : index
    %137 = vector.load %arg8[%c3_135, %c0_136, %c0_137] : memref<4x1x128xf32, #tpu.memory_space<vmem>>, vector<1x1x128xf32>
    %138 = vector.shape_cast %137 : vector<1x1x128xf32> to vector<1x128xf32>
    %139 = vector.broadcast %138 : vector<1x128xf32> to vector<16x128xf32>
    %140 = arith.addf %136, %139 : vector<16x128xf32>
    %141 = arith.addf %110, %140 : vector<16x128xf32>
    %142 = arith.mulf %141, %3 : vector<16x128xf32>
    %143 = arith.truncf %142 : vector<16x128xf32> to vector<16x128xbf16>
    %c0_138 = arith.constant 0 : index
    %c0_139 = arith.constant 0 : index
    %144 = vector.load %arg9[%c0_138, %c0_139] : memref<128x128xbf16, #tpu.memory_space<vmem>>, vector<128x128xbf16>
    %cst_140 = arith.constant dense<0.000000e+00> : vector<16x128xf32>
    %145 = tpu.matmul %143, %144, %cst_140 {dimension_numbers = #tpu.dot_dimension_numbers<[1], [0], [0], [1], [0, 0, 1, 1], [], []>} : vector<16x128xbf16>, vector<128x128xbf16>, vector<16x128xf32> -> vector<16x128xf32>
    %c0_141 = arith.constant 0 : index
    %c0_142 = arith.constant 0 : index
    %146 = vector.load %arg10[%c0_141, %c0_142] : memref<1x128xf32, #tpu.memory_space<vmem>>, vector<1x128xf32>
    %147 = vector.broadcast %146 : vector<1x128xf32> to vector<16x128xf32>
    %148 = arith.addf %145, %147 : vector<16x128xf32>
    %149 = arith.mulf %148, %3 : vector<16x128xf32>
    %150 = vector.extract_strided_slice %149 {offsets = [0, 0], sizes = [16, 8], strides = [1, 1]} : vector<16x128xf32> to vector<16x8xf32>
    %c0_143 = arith.constant 0 : index
    %c0_144 = arith.constant 0 : index
    %c0_145 = arith.constant 0 : index
    %151 = vector.load %arg11[%c0_143, %c0_144, %c0_145] : memref<1x16x8xf32, #tpu.memory_space<vmem>>, vector<1x16x8xf32>
    %152 = vector.shape_cast %151 : vector<1x16x8xf32> to vector<16x8xf32>
    %153 = vector.shape_cast %150 : vector<16x8xf32> to vector<1x16x8xf32>
    tpu.vector_store %arg11[%c0_143, %c0_144, %c0_145], %153 {strides = array<i32>} : memref<1x16x8xf32, #tpu.memory_space<vmem>>, vector<1x16x8xf32>,
    return
  }
  func.func @transform_0(%arg0: i32) -> (i32, i32, i32) {
    %c0_i32 = arith.constant 0 : i32
    %c0_i32_0 = arith.constant 0 : i32
    %c0_i32_1 = arith.constant 0 : i32
    return %arg0, %c0_i32, %c0_i32_0 : i32, i32, i32
  }
  func.func @transform_1(%arg0: i32) -> (i32, i32, i32) {
    %c0_i32 = arith.constant 0 : i32
    %c0_i32_0 = arith.constant 0 : i32
    %c0_i32_1 = arith.constant 0 : i32
    return %arg0, %c0_i32, %c0_i32_0 : i32, i32, i32
  }
  func.func @transform_2(%arg0: i32) -> (i32, i32) {
    %c0_i32 = arith.constant 0 : i32
    %c0_i32_0 = arith.constant 0 : i32
    %c0_i32_1 = arith.constant 0 : i32
    return %c0_i32, %c0_i32_0 : i32, i32
  }
  func.func @transform_3(%arg0: i32) -> (i32, i32) {
    %c0_i32 = arith.constant 0 : i32
    %c0_i32_0 = arith.constant 0 : i32
    %c0_i32_1 = arith.constant 0 : i32
    return %c0_i32, %c0_i32_0 : i32, i32
  }
  func.func @transform_4(%arg0: i32) -> (i32, i32, i32, i32) {
    %c0_i32 = arith.constant 0 : i32
    %c0_i32_0 = arith.constant 0 : i32
    %c0_i32_1 = arith.constant 0 : i32
    %c0_i32_2 = arith.constant 0 : i32
    %c0_i32_3 = arith.constant 0 : i32
    return %c0_i32, %c0_i32_0, %c0_i32_1, %c0_i32_2 : i32, i32, i32, i32
  }
  func.func @transform_5(%arg0: i32) -> (i32, i32, i32) {
    %c0_i32 = arith.constant 0 : i32
    %c0_i32_0 = arith.constant 0 : i32
    %c0_i32_1 = arith.constant 0 : i32
    %c0_i32_2 = arith.constant 0 : i32
    return %c0_i32, %c0_i32_0, %c0_i32_1 : i32, i32, i32
  }
  func.func @transform_6(%arg0: i32) -> (i32, i32, i32) {
    %c0_i32 = arith.constant 0 : i32
    %c0_i32_0 = arith.constant 0 : i32
    %c0_i32_1 = arith.constant 0 : i32
    %c0_i32_2 = arith.constant 0 : i32
    return %c0_i32, %c0_i32_0, %c0_i32_1 : i32, i32, i32
  }
  func.func @transform_7(%arg0: i32) -> (i32, i32, i32) {
    %c0_i32 = arith.constant 0 : i32
    %c0_i32_0 = arith.constant 0 : i32
    %c0_i32_1 = arith.constant 0 : i32
    %c0_i32_2 = arith.constant 0 : i32
    return %c0_i32, %c0_i32_0, %c0_i32_1 : i32, i32, i32
  }
  func.func @transform_8(%arg0: i32) -> (i32, i32) {
    %c0_i32 = arith.constant 0 : i32
    %c0_i32_0 = arith.constant 0 : i32
    %c0_i32_1 = arith.constant 0 : i32
    return %c0_i32, %c0_i32_0 : i32, i32
  }
  func.func @transform_9(%arg0: i32) -> (i32, i32) {
    %c0_i32 = arith.constant 0 : i32
    %c0_i32_0 = arith.constant 0 : i32
    %c0_i32_1 = arith.constant 0 : i32
    return %c0_i32, %c0_i32_0 : i32, i32
  }
  func.func @transform_10(%arg0: i32) -> (i32, i32, i32) {
    %c0_i32 = arith.constant 0 : i32
    %c0_i32_0 = arith.constant 0 : i32
    %c0_i32_1 = arith.constant 0 : i32
    return %arg0, %c0_i32, %c0_i32_0 : i32, i32, i32
  }
}

</mosaic_0001>

<bundles_post_ra>
// kernel: tpu_custom_call.1
= control target key start
LH: loop header
LB: loop body
LE: loop exit
PB: predicated region body
PF: predicated region fallthrough
CT: control target
= control target key end

     0   :  { %15 = vsyncpa [#allocation4], 0  ;;  %s4315_s0 = inlined_call_operand.vmem [shape: f32[2,16,24], index: 0, kind: input, shape index: {}]   ;;  %s4316_s1 = inlined_call_operand.vmem [shape: f32[2,16,1], index: 1, kind: input, shape index: {}]   ;;  %s4317_s2 = inlined_call_operand.hbm [shape: f32[24,128], index: 2, kind: input, shape index: {}]   ;;  %s4318_s3 = inlined_call_operand.vmem [shape: f32[1,128], index: 3, kind: input, shape index: {}]   ;;  %s4319_s4 = inlined_call_operand.hbm [shape: bf16[4,3,128,128], index: 4, kind: input, shape index: {}]   ;;  %s4320_s5 = inlined_call_operand.vmem [shape: f32[4,1,128], index: 5, kind: input, shape index: {}]   ;;  %s4321_s6 = inlined_call_operand.hbm [shape: bf16[4,128,128], index: 6, kind: input, shape index: {}]   ;;  %s4322_s7 = inlined_call_operand.vmem [shape: f32[4,1,128], index: 7, kind: input, shape index: {}]   ;;  %s4323_s8 = inlined_call_operand.hbm [shape: bf16[128,128], index: 8, kind: input, shape index: {}]   ;;  %s4324_s9 = inlined_call_operand.vmem [shape: f32[1,128], index: 9, kind: input, shape index: {}]   ;;  %s4325_s10 = inlined_call_operand.vmem [shape: f32[2,16,8], index: 10, kind: output, shape index: {}]  }
   0x1   :  { %16 = vsyncpa [#allocation6], 0 }
   0x2   :  { %17 = vsyncpa [#allocation9], 0  ;;  %s3952_s13 = smov 0  }
   0x3 LB: > { %s3886_s14 = smov [#allocation5]   ;;  %s3958_s16 = sadd.s32 4294967295, %s3884_s13   ;;  %s3884_s13 = sphi %s3952_s13, %s23_s13  }
   0x4   : > { %s302_s15 = sshll.u32 %s3886_s14, 4  ;;  %p2806_p0 = scmp.ge.s32.totalorder %s3884_s13, 1  ;;  %s303_s15 = int_to_ptr.vmem [resolvable:$true] %s302_s15 }
   0x5   : > { %p274_p1 = scmp.lt.s32.totalorder %s3884_s13, 3  ;;  %p3578_p2 = scmp.eq.s32.totalorder %s3958_s16, 0 }
   0x6   : > { %s3887_s18 = smov [#allocation3]   ;;  %s3888_s21 = smov [#allocation7]  }
   0x7   : > { %p3963_p3 = pnand %p2806_p0, %p274_p1  ;;  %s286_s19 = sshll.u32 %s3887_s18, 4  ;;  %s3969_s19 = int_to_ptr.vmem [resolvable:$true] %s286_s19 }
   0x8   : > { %s3977_s22 = sshll.u32 %s3888_s21, 4  ;;  %s3773_s23 = scalar_lea.vmem %s303_s15, 12288  ;;  %s319_s22 = int_to_ptr.vmem [resolvable:$true] %s3977_s22 }
   0x9   : > { %p3565_p4 = pneg %p3963_p3  ;;  %p3774_p7 = scmp.ne.s32.totalorder %s303_s15, %s3773_s23 }
   0xa   : > { %p3781_p10 = scmp.lt.s32.totalorder %s303_s15, %s303_s15  ;;  %p3782_p11 = scmp.lt.s32.totalorder %s3773_s23, %s3773_s23 }
   0xb   : > { %p3973_p5 = pnand %p3578_p2, %p3565_p4 }
   0xc   : > { %p3783_p12 = por %p3782_p11, %p3781_p10 }
   0xd   : > { %p3764_p6 = pneg %p3973_p5 }
   0xf   : > { %p3776_p8 = pnand %p3774_p7, %p3764_p6 }
  0x11   : > { %p3777_p9 = pneg %p3776_p8 }
  0x13   : > { %p3784_p13 = pnand %p3783_p12, %p3777_p9 }
  0x15   : > { %3787 = shalt.err (!%p3784_p13)
}
  0x16   : > { %s3889_s24 = smov 64   ;;  %s3890_s25 = smov 4  }
  0x17   : > { %3571 = dma.hbm_to_vmem [thread:$0]  (!%p3973_p5), %s4319_s4, 12288, %s303_s15, [#allocation6], %s3889_s24, %s3889_s24, %s3890_s25  }
  0x18   : > { %s3799_s28 = scalar_lea.vmem %s3969_s19, 384  ;;  %p3807_p7 = scmp.lt.s32.totalorder %s3969_s19, %s3969_s19 }
  0x19   : > { %p3800_p0 = scmp.ne.s32.totalorder %s3969_s19, %s3799_s28  ;;  %p3808_p8 = scmp.lt.s32.totalorder %s3799_s28, %s3799_s28 }
  0x1b   : > { %p3802_p1 = pnand %p3800_p0, %p3764_p6  ;;  %p3809_p9 = por %p3808_p8, %p3807_p7 }
  0x1d   : > { %p3803_p4 = pneg %p3802_p1 }
  0x1f   : > { %p3810_p10 = pnand %p3809_p9, %p3803_p4 }
  0x21   : > { %3813 = shalt.err (!%p3810_p10)
}
  0x22   : > { %s3891_s29 = smov 128   ;;  %s3892_s30 = smov 8  }
  0x23   : > { %3568 = dma.hbm_to_vmem [thread:$0]  (!%p3973_p5), %s4317_s2, 384, %s3969_s19, [#allocation4], %s3891_s29, %s3891_s29, %s3892_s30  }
  0x24   : > { %s3893_s14 = smov [#allocation8]   ;;  %s3825_s18 = scalar_lea.vmem %s319_s22, 4096 }
  0x25   : > { %s334_s15 = sshll.u32 %s3893_s14, 4  ;;  %p3826_p11 = scmp.ne.s32.totalorder %s319_s22, %s3825_s18  ;;  %s335_s15 = int_to_ptr.vmem [resolvable:$true] %s334_s15 }
  0x26   : > { %p3833_p0 = scmp.lt.s32.totalorder %s319_s22, %s319_s22  ;;  %p3834_p1 = scmp.lt.s32.totalorder %s3825_s18, %s3825_s18 }
  0x27   : > { %p3828_p12 = pnand %p3826_p11, %p3764_p6 }
  0x28   : > { %p3835_p4 = por %p3834_p1, %p3833_p0 }
  0x29   : > { %p3829_p13 = pneg %p3828_p12 }
  0x2b   : > { %p3836_p7 = pnand %p3835_p4, %p3829_p13 }
  0x2d   : > { %3839 = shalt.err (!%p3836_p7)
}
  0x2e   : > { %3574 = dma.hbm_to_vmem [thread:$0]  (!%p3973_p5), %s4321_s6, 4096, %s319_s22, [#allocation6], %s3889_s24, %s3889_s24, %s3890_s25  }
  0x2f   : > { %s3851_s23 = scalar_lea.vmem %s335_s15, 1024  ;;  %p3859_p11 = scmp.lt.s32.totalorder %s335_s15, %s335_s15 }
  0x30   : > { %p3852_p8 = scmp.ne.s32.totalorder %s335_s15, %s3851_s23  ;;  %p3860_p12 = scmp.lt.s32.totalorder %s3851_s23, %s3851_s23 }
  0x32   : > { %p3854_p9 = pnand %p3852_p8, %p3764_p6  ;;  %p3861_p13 = por %p3860_p12, %p3859_p11 }
  0x34   : > { %p3855_p10 = pneg %p3854_p9 }
  0x36   : > { %p3862_p0 = pnand %p3861_p13, %p3855_p10 }
  0x38   : > { %3865 = shalt.err (!%p3862_p0)
}
  0x39   : > { %3577 = dma.hbm_to_vmem [thread:$0]  (!%p3973_p5), %s4323_s8, 1024, %s335_s15, [#allocation9], %s3889_s24, %s3889_s24, %s3890_s25  }
  0x3a   : > { %369 = sbr.rel (%p3963_p3) target bundleno = 2284 (0x8ec), region = 60 }
  0x3f   : > { %3871 = dma.done.wait (%p3578_p2), [#allocation4], 384  }
  0x40   : > { %3873 = vsyncadd (%p3578_p2), [#allocation4], 4294966912 }
  0x41   : > { %3875 = dma.done.wait (%p3578_p2), [#allocation6], 16384  }
  0x42   : > { %3877 = vsyncadd (%p3578_p2), [#allocation6], 4294950912 }
  0x43   : > { %3879 = dma.done.wait (%p3578_p2), [#allocation9], 1024  }
  0x44   : > { %3881 = vsyncadd (%p3578_p2), [#allocation9], 4294966272  ;;  %p424_p3 = scmp.lt.s32.totalorder %s3958_s16, 1  ;;  %v3894_v0 = vmov 0.0   ;;  %vm468_vm0 = vcmask 195584   ;;  %v460_v1 = vld [vmem:[#allocation3 + $0x10] sm:$0xff] }
  0x45   : > { %3209 = vmatprep.subr.bf16.mxu1 %v3894_v0  ;;  %v459_v2 = vld [vmem:[#allocation3 + $0x8] sm:$0xff]  ;;  %3200 = vmatprep.subr.mxu0 %v460_v1  ;;  %v458_v3 = vld [vmem:[#allocation3] sm:$0xff]  ;;  %v3606_v5 = vld [vmem:[#allocation5 + $0x78] sm:$0xff]   ;;  %v3895_v19 = vmov 0   ;;  %vm3896_vm1 = vmmov 0   ;;  %vm1213_vm4 = vcmask 1044480  }
  0x46   : > { %s4329_s16 = smov (!%p424_p3, %s3958_s16), 1  ;;  %3201 = vmatpush3.msra.mxu0 %v460_v1  ;;  %3210 = vmatpush3.bf16.msra.mxu1 %v3606_v5  ;;  %v3607_v7 = vld [vmem:[#allocation5 + $0x70] sm:$0xff]   ;;  %v3609_v8 = vld [vmem:[#allocation5 + $0x38] sm:$0xff]   ;;  %v3608_v9 = vld [vmem:[#allocation5 + $0x68] sm:$0xff]   ;;  %453 = vst [vmem:[#allocation2 + $0x4] sm:$0xf] %v3895_v19 }
  0x47   : > { %s4045_s17 = sshll.u32 %s4329_s16, 4  ;;  %3202 = vmatprep.subr.mxu0 %v459_v2  ;;  %3211 = vmatprep.subr.bf16.mxu1 %v3894_v0  ;;  %v3611_v10 = vld [vmem:[#allocation5 + $0x30] sm:$0xff]   ;;  %v3610_v11 = vld [vmem:[#allocation5 + $0x60] sm:$0xff]   ;;  %v3612_v12 = vld [vmem:[#allocation5 + $0x58] sm:$0xff]   ;;  %454 = vst [vmem:[#allocation2 + $0x10] sm:$0xf] %v3895_v19 }
  0x48   : > { %s428_s24 = scalar_lea.vmem %s4315_s0, %s4045_s17  ;;  %3203 = vmatpush3.msra.mxu0 %v459_v2  ;;  %v3613_v13 = vld [vmem:[#allocation5 + $0x28] sm:$0xff]   ;;  %v3614_v14 = vld [vmem:[#allocation5 + $0x50] sm:$0xff]   ;;  %v3615_v15 = vld [vmem:[#allocation5 + $0x20] sm:$0xff]   ;;  %3605 = vset.pattern.permute.xlu0 %v3895_v19  ;;  %vm695_vm2 = vsmask.f32 4352  ;;  %s433_s30 = scalar_lea.vmem %s4316_s1, %s4045_s17  ;;  %vm1335_vm5 = vcmask 1046528  }
  0x49   : > { %v456_v4 = vld [vmem:[%s428_s24] sm:$0xff]  ;;  %v457_v6 = vld [vmem:[%s428_s24 + $0x8] sm:$0xff]  ;;  %3204 = vmatprep.subr.mxu0 %v458_v3  ;;  %v3616_v16 = vld [vmem:[#allocation5 + $0x48] sm:$0xff]   ;;  %3225 = vmatprep.mubr.msk.bf16.mxu1 %vm3896_vm1, %v3894_v0  ;;  %vm831_vm3 = vsmask.f32 7424  ;;  %vm1711_vm6 = vcmask 1045504   ;;  %s438_s14 = scalar_lea.vmem %s4325_s10, %s4045_s17 }
  0x4a   : > { %3206 = vmatprep.mubr.msk.f32.mxu0 %vm468_vm0, %v456_v4  ;;  %3205 = vmatpush3.msra.mxu0 %v458_v3  ;;  %v3617_v17 = vld [vmem:[#allocation5 + $0x18] sm:$0xff]   ;;  %v3618_v18 = vld [vmem:[#allocation5 + $0x40] sm:$0xff]   ;;  %v3619_v20 = vld [vmem:[#allocation5 + $0x10] sm:$0xff]   ;;  %vm2693_vm7 = vcmask 64512  }
  0x4b   : > { %3207 = vmatmul.mubr.msk.f32.vlgmr.msra.gmra.mxu0 %vm468_vm0, %v457_v6  ;;  %3229 = vmatprep.subr.bf16.mxu0 %v3894_v0  ;;  %v3622_v21 = vld [vmem:[#allocation5 + $0x8] sm:$0xff]   ;;  %v3624_v22 = vld [vmem:[#allocation5] sm:$0xff]   ;;  %v2823_v24 = vld [vmem:[%s4318_s3] ss:$0 sm:$0xff] }
  0x4c   : > { %3212 = vmatpush3.bf16.msra.mxu1 %v3607_v7  ;;  %3230 = vmatpush3.bf16.msra.mxu0 %v3609_v8  ;;  %v3623_v30 = vld [vmem:[#allocation5 + $0xb8] sm:$0xff]   ;;  %v3625_v40 = vld [vmem:[#allocation5 + $0xb0] sm:$0xff]   ;;  %v3627_v47 = vld [vmem:[#allocation5 + $0xa8] sm:$0xff]  }
  0x4d   : > { %3213 = vmatprep.subr.bf16.mxu1 %v3894_v0  ;;  %3231 = vmatprep.subr.bf16.mxu0 %v3894_v0  ;;  %v560_v29 = vld [vmem:[#allocation2 + $0x4] sm:$0x8]  ;;  %v3628_v49 = vld [vmem:[#allocation5 + $0xa0] sm:$0xff]   ;;  %v3629_v50 = vld [vmem:[#allocation5 + $0x98] sm:$0xff]  }
  0x4e   : > { %3245 = vmatprep.mubr.msk.bf16.mxu0 %vm3896_vm1, %v3894_v0  ;;  %v3630_v52 = vld [vmem:[#allocation5 + $0x90] sm:$0xff]   ;;  %v3634_v53 = vld [vmem:[#allocation2 + $0x10] ss:$0 sps:$4 sm:$0x11]   ;;  %v3631_v55 = vld [vmem:[#allocation5 + $0x88] sm:$0xff]  }
  0x4f   : > { %v840_v57 = vshll.u32 %v3634_v53, 16  ;;  %v3632_v58 = vld [vmem:[#allocation5 + $0x80] sm:$0xff]   ;;  %v3635_v63 = vld [vmem:[#allocation7 + $0x38] sm:$0xff]   ;;  %v3636_v1 = vld [vmem:[#allocation7 + $0x30] sm:$0xff]  }
  0x50   : > { %3214 = vmatpush3.bf16.msra.mxu1 %v3608_v9  ;;  %3232 = vmatpush3.bf16.msra.mxu0 %v3611_v10  ;;  %v3637_v2 = vld [vmem:[#allocation7 + $0x28] sm:$0xff]   ;;  %v3638_v3 = vld [vmem:[#allocation7 + $0x20] sm:$0xff]   ;;  %v3639_v4 = vld [vmem:[#allocation7 + $0x18] sm:$0xff]  }
  0x51   : > { %3215 = vmatprep.subr.bf16.mxu1 %v3894_v0  ;;  %3233 = vmatprep.subr.bf16.mxu0 %v3894_v0  ;;  %v842_v61 = vrot.slane %v840_v57, 1  ;;  %v3640_v5 = vld [vmem:[#allocation7 + $0x10] sm:$0xff]   ;;  %v3641_v6 = vld [vmem:[#allocation7 + $0x8] sm:$0xff]   ;;  %v3642_v7 = vld [vmem:[#allocation7] sm:$0xff]  }
  0x52   : > { %v3643_v8 = vld [vmem:[#allocation5 + $0x138] sm:$0xff]   ;;  %v440_v9 = vld [vmem:[%s433_s30] sm:$0xff] }
  0x53   : > { %444 = vperm.xlu0 %3605, %v440_v9   ;;  %v3644_v10 = vld [vmem:[#allocation5 + $0x130] sm:$0xff]  }
  0x54   : > { %3216 = vmatpush3.bf16.msra.mxu1 %v3610_v11  ;;  %3234 = vmatpush3.bf16.msra.mxu0 %v3613_v13  ;;  %v441_v11 = vld [vmem:[%s433_s30 + $0x8] sm:$0xff] }
  0x55   : > { %3217 = vmatprep.subr.bf16.mxu1 %v3894_v0  ;;  %3235 = vmatprep.subr.bf16.mxu0 %v3894_v0 }
  0x57   : > { %449 = vperm.xlu0 %3605, %v441_v11   ;;  %v3665_v11 = vld [vmem:[#allocation5 + $0x160] sm:$0xff]  }
  0x58   : > { %3218 = vmatpush3.bf16.msra.mxu1 %v3612_v12  ;;  %3236 = vmatpush3.bf16.msra.mxu0 %v3615_v15  ;;  %v3646_v12 = vld [vmem:[#allocation5 + $0x128] sm:$0xff]  }
  0x59   : > { %3219 = vmatprep.subr.bf16.mxu1 %v3894_v0  ;;  %3237 = vmatprep.subr.bf16.mxu0 %v3894_v0 }
  0x5c   : > { %3220 = vmatpush3.bf16.msra.mxu1 %v3614_v14  ;;  %3238 = vmatpush3.bf16.msra.mxu0 %v3617_v17 }
  0x5d   : > { %3221 = vmatprep.subr.bf16.mxu1 %v3894_v0  ;;  %3239 = vmatprep.subr.bf16.mxu0 %v3894_v0 }
  0x60   : > { %3222 = vmatpush3.bf16.msra.mxu1 %v3616_v16  ;;  %3240 = vmatpush3.bf16.msra.mxu0 %v3619_v20 }
  0x61   : > { %3223 = vmatprep.subr.bf16.mxu1 %v3894_v0  ;;  %3241 = vmatprep.subr.bf16.mxu0 %v3894_v0 }
  0x64   : > { %3224 = vmatpush3.bf16.msra.mxu1 %v3618_v18  ;;  %3242 = vmatpush3.bf16.msra.mxu0 %v3622_v21 }
  0x65   : > { %3249 = vmatprep.subr.bf16.mxu1 %v3894_v0  ;;  %3243 = vmatprep.subr.bf16.mxu0 %v3894_v0 }
  0x68   : > { %3244 = vmatpush3.bf16.msra.mxu0 %v3624_v22 }
  0x69   : > { %3269 = vmatprep.subr.bf16.mxu0 %v3894_v0 }
  0xce   : > { %v4135_v53 = vpop.permute.xlu0 %444 }
 0x10b   : > { %v3208_v23 = vpop.f32.mrf.mxu0 }
 0x10c   : > { %v4077_v26 = vadd.f32 %v3208_v23, %v2823_v24 }
 0x10d   : > { %v541_v25 = vpop.f32.mrf.mxu0 }
 0x10e   : > { %v4079_v27 = vadd.f32 %v2823_v24, %v541_v25  ;;  %v2857_v24 = vld [vmem:[%s4320_s5] ss:$0 sm:$0xff] }
 0x110   : > { %v3021_v28 = vpack.c.bf16 %v4077_v26, %v4079_v27 }
 0x112   : > { %3038 = vst [vmem:[#allocation2 + $0x8] sm:$0xff] %v3021_v28  }
 0x119   : > { %v561_v31 = vld [vmem:[#allocation2 + $0x8] sm:$0xf]  ;;  %v562_v32 = vld [vmem:[#allocation2 + $0xc] sm:$0xf] }
 0x11a   : > { %v2828_v33 = vcombine.low %v561_v31, %v562_v32  ;;  %v2837_v34 = vcombine.low %v560_v29, %v561_v31  ;;  %v2838_v35 = vcombine.low %v562_v32, %v562_v32  ;;  %v3633_v51 = vld [vmem:[#allocation2 + $0x8] sm:$0xff]  }
 0x11b   : > { %v835_v54 = vshll.u32 %v3633_v51, 16  ;;  %v833_v59 = vshrl.u32 %v3633_v51, 16 }
 0x11c   : > { %3226 = vmatmul.mubr.bf16.vlgmr.msra.gmra.mxu1 %v2828_v33  ;;  %v697_v36 = vshrl.u32 %v2837_v34, 16  ;;  %v700_v37 = vshll.u32 %v2837_v34, 16  ;;  %v705_v38 = vshrl.u32 %v2838_v35, 16  ;;  %v708_v39 = vshll.u32 %v2838_v35, 16 }
 0x11d   : > { %3250 = vmatpush3.bf16.msra.mxu1 %v3623_v30  ;;  %3265 = vmatprep.mubr.msk.bf16.mxu1 %vm3896_vm1, %v3894_v0  ;;  %v837_v56 = vrot.slane %v835_v54, 1 }
 0x11e   : > { %3251 = vmatprep.subr.bf16.mxu1 %v3894_v0  ;;  %v699_v41 = vrot.slane %v697_v36, 3  ;;  %v702_v42 = vrot.slane %v700_v37, 4  ;;  %v707_v43 = vrot.slane %v705_v38, 3  ;;  %v710_v44 = vrot.slane %v708_v39, 4  ;;  %v3645_v36 = vld [vmem:[#allocation5 + $0xf8] sm:$0xff]   ;;  %v3647_v38 = vld [vmem:[#allocation5 + $0xf0] sm:$0xff]  }
 0x11f   : > { %v838_v60 = vor.u32 %v837_v56, %v833_v59  ;;  %v3648_v39 = vld [vmem:[#allocation5 + $0x120] sm:$0xff]  }
 0x120   : > { %v703_v45 = vor.u32 %v702_v42, %v699_v41  ;;  %v711_v46 = vor.u32 %v710_v44, %v707_v43  ;;  %v3650_v41 = vld [vmem:[#allocation5 + $0x118] sm:$0xff]   ;;  %v3651_v42 = vld [vmem:[#allocation5 + $0xe0] sm:$0xff]   ;;  %v3652_v43 = vld [vmem:[#allocation5 + $0x110] sm:$0xff]  }
 0x121   : > { %3252 = vmatpush3.bf16.msra.mxu1 %v3625_v40  ;;  %v843_v62 = vsel %vm831_vm3, %v838_v60, %v842_v61  ;;  %v3649_v40 = vld [vmem:[#allocation5 + $0xe8] sm:$0xff]   ;;  %v3653_v44 = vld [vmem:[#allocation5 + $0xd8] sm:$0xff]   ;;  %v4139_v60 = vpop.permute.xlu0 %449 }
 0x122   : > { %v712_v48 = vsel %vm695_vm2, %v703_v45, %v711_v46  ;;  %3253 = vmatprep.subr.bf16.mxu1 %v3894_v0  ;;  %v3654_v45 = vld [vmem:[#allocation5 + $0x108] sm:$0xff]   ;;  %v3655_v46 = vld [vmem:[#allocation5 + $0xd0] sm:$0xff]  }
 0x123   : > { %3246 = vmatmul.mubr.bf16.vlgmr.msra.gmra.mxu0 %v712_v48  ;;  %v3657_v48 = vld [vmem:[#allocation5 + $0xc8] sm:$0xff]  }
 0x124   : > { %3285 = vmatprep.mubr.msk.bf16.mxu0 %vm3896_vm1, %v3894_v0  ;;  %3270 = vmatpush3.bf16.msra.mxu0 %v3635_v63 }
 0x125   : > { %3254 = vmatpush3.bf16.msra.mxu1 %v3627_v47  ;;  %3271 = vmatprep.subr.bf16.mxu0 %v3894_v0  ;;  %v3656_v47 = vld [vmem:[#allocation5 + $0x100] sm:$0xff]  }
 0x126   : > { %3255 = vmatprep.subr.bf16.mxu1 %v3894_v0 }
 0x128   : > { %3272 = vmatpush3.bf16.msra.mxu0 %v3636_v1  ;;  %v1074_v1 = vld [vmem:[#allocation2 + $0x4] sm:$0x8] }
 0x129   : > { %3256 = vmatpush3.bf16.msra.mxu1 %v3628_v49  ;;  %3273 = vmatprep.subr.bf16.mxu0 %v3894_v0  ;;  %v3659_v49 = vld [vmem:[#allocation5 + $0xc0] sm:$0xff]  }
 0x12a   : > { %3257 = vmatprep.subr.bf16.mxu1 %v3894_v0 }
 0x12c   : > { %3274 = vmatpush3.bf16.msra.mxu0 %v3637_v2  ;;  %v3660_v2 = vld [vmem:[#allocation5 + $0x178] sm:$0xff]  }
 0x12d   : > { %3258 = vmatpush3.bf16.msra.mxu1 %v3629_v50  ;;  %3275 = vmatprep.subr.bf16.mxu0 %v3894_v0  ;;  %v2858_v50 = vld [vmem:[%s4322_s7] ss:$0 sm:$0xff] }
 0x12e   : > { %3259 = vmatprep.subr.bf16.mxu1 %v3894_v0 }
 0x130   : > { %3276 = vmatpush3.bf16.msra.mxu0 %v3638_v3 }
 0x131   : > { %3260 = vmatpush3.bf16.msra.mxu1 %v3630_v52  ;;  %3277 = vmatprep.subr.bf16.mxu0 %v3894_v0 }
 0x132   : > { %3261 = vmatprep.subr.bf16.mxu1 %v3894_v0 }
 0x134   : > { %3278 = vmatpush3.bf16.msra.mxu0 %v3639_v4 }
 0x135   : > { %3262 = vmatpush3.bf16.msra.mxu1 %v3631_v55  ;;  %3279 = vmatprep.subr.bf16.mxu0 %v3894_v0 }
 0x136   : > { %3263 = vmatprep.subr.bf16.mxu1 %v3894_v0 }
 0x138   : > { %3280 = vmatpush3.bf16.msra.mxu0 %v3640_v5 }
 0x139   : > { %3264 = vmatpush3.bf16.msra.mxu1 %v3632_v58  ;;  %3281 = vmatprep.subr.bf16.mxu0 %v3894_v0 }
 0x13a   : > { %3289 = vmatprep.subr.bf16.mxu1 %v3894_v0 }
 0x13c   : > { %3266 = vmatmul.mubr.bf16.vlgmr.msra.gmra.mxu1 %v843_v62  ;;  %3282 = vmatpush3.bf16.msra.mxu0 %v3641_v6 }
 0x13d   : > { %3305 = vmatprep.mubr.msk.bf16.mxu1 %vm3896_vm1, %v3894_v0  ;;  %3283 = vmatprep.subr.bf16.mxu0 %v3894_v0 }
 0x13e   : > { %3290 = vmatpush3.bf16.msra.mxu1 %v3643_v8  ;;  %v3663_v8 = vld [vmem:[#allocation5 + $0x170] sm:$0xff]  }
 0x13f   : > { %3291 = vmatprep.subr.bf16.mxu1 %v3894_v0 }
 0x140   : > { %3284 = vmatpush3.bf16.msra.mxu0 %v3642_v7 }
 0x141   : > { %3309 = vmatprep.subr.bf16.mxu0 %v3894_v0 }
 0x142   : > { %3292 = vmatpush3.bf16.msra.mxu1 %v3644_v10  ;;  %v3664_v10 = vld [vmem:[#allocation5 + $0x168] sm:$0xff]  }
 0x143   : > { %3293 = vmatprep.subr.bf16.mxu1 %v3894_v0 }
 0x146   : > { %3294 = vmatpush3.bf16.msra.mxu1 %v3646_v12  ;;  %v3666_v12 = vld [vmem:[#allocation5 + $0x158] sm:$0xff]  }
 0x147   : > { %3295 = vmatprep.subr.bf16.mxu1 %v3894_v0 }
 0x14a   : > { %3296 = vmatpush3.bf16.msra.mxu1 %v3648_v39 }
 0x14b   : > { %3297 = vmatprep.subr.bf16.mxu1 %v3894_v0 }
 0x14e   : > { %3298 = vmatpush3.bf16.msra.mxu1 %v3650_v41 }
 0x14f   : > { %3299 = vmatprep.subr.bf16.mxu1 %v3894_v0 }
 0x152   : > { %3300 = vmatpush3.bf16.msra.mxu1 %v3652_v43 }
 0x153   : > { %3301 = vmatprep.subr.bf16.mxu1 %v3894_v0 }
 0x156   : > { %3302 = vmatpush3.bf16.msra.mxu1 %v3654_v45  ;;  %v2899_v45 = vld [vmem:[%s4320_s5 + $0x1] ss:$0 sm:$0xff] }
 0x157   : > { %3303 = vmatprep.subr.bf16.mxu1 %v3894_v0 }
 0x15a   : > { %3304 = vmatpush3.bf16.msra.mxu1 %v3656_v47 }
 0x15b   : > { %3329 = vmatprep.subr.bf16.mxu1 %v3894_v0 }
 0x1dc   : > { %v684_v13 = vpop.f32.mrf.mxu1 }
 0x1de   : > { %v3227_v14 = vpop.f32.mrf.mxu1 }
 0x1df   : > { %v3668_v14 = vld [vmem:[#allocation5 + $0x148] sm:$0xff]  }
 0x1e0   : > { %v687_v15 = vpop.f32.mrf.mxu1 }
 0x1e2   : > { %v3228_v16 = vpop.f32.mrf.mxu1 }
 0x1e3   : > { %v796_v17 = vpop.f32.mrf.mxu0  ;;  %v3671_v16 = vld [vmem:[#allocation2 + $0x10] ss:$0 sps:$4 sm:$0x11]  }
 0x1e4   : > { %v797_v21 = vadd.f32 %v796_v17, %v684_v13  ;;  %v3667_v13 = vld [vmem:[#allocation5 + $0x150] sm:$0xff]   ;;  %v3669_v17 = vld [vmem:[#allocation5 + $0x140] sm:$0xff]  }
 0x1e5   : > { %v3247_v18 = vpop.f32.mrf.mxu0 }
 0x1e7   : > { %v799_v19 = vpop.f32.mrf.mxu0 }
 0x1e8   : > { %v800_v28 = vadd.f32 %v799_v19, %v687_v15  ;;  %v1337_v19 = vrot.slane %v3671_v16, 1 }
 0x1e9   : > { %v3248_v20 = vpop.f32.mrf.mxu0 }
 0x1fc   : > { %v927_v22 = vpop.f32.mrf.mxu1 }
 0x1fd   : > { %v934_v23 = vadd.f32 %v927_v22, %v797_v21  ;;  %v3672_v21 = vld [vmem:[#allocation7 + $0x78] sm:$0xff]   ;;  %v3673_v22 = vld [vmem:[#allocation7 + $0x70] sm:$0xff]  }
 0x1fe   : > { %v3267_v25 = vpop.f32.mrf.mxu1 }
 0x1ff   : > { %v943_v30 = vadd.f32 %v2857_v24, %v934_v23  ;;  %v3674_v23 = vld [vmem:[#allocation7 + $0x68] sm:$0xff]   ;;  %v3676_v25 = vld [vmem:[#allocation7 + $0x58] sm:$0xff]  }
 0x200   : > { %v930_v29 = vpop.f32.mrf.mxu1 }
 0x201   : > { %v935_v31 = vadd.f32 %v930_v29, %v800_v28  ;;  %v945_v34 = vmax.f32 %v943_v30, 0.0  ;;  %v3677_v28 = vld [vmem:[#allocation7 + $0x50] sm:$0xff]   ;;  %v3678_v29 = vld [vmem:[#allocation7 + $0x48] sm:$0xff]   ;;  %v3679_v30 = vld [vmem:[#allocation7 + $0x40] sm:$0xff]  }
 0x202   : > { %v3268_v32 = vpop.f32.mrf.mxu1 }
 0x203   : > { %v944_v33 = vadd.f32 %v2857_v24, %v935_v31  ;;  %v3675_v24 = vld [vmem:[#allocation7 + $0x60] sm:$0xff]   ;;  %v3680_v31 = vld [vmem:[#allocation5 + $0x1f8] sm:$0xff]   ;;  %v3681_v32 = vld [vmem:[#allocation5 + $0x1f0] sm:$0xff]  }
 0x205   : > { %v946_v35 = vmax.f32 %v944_v33, 0.0  ;;  %v3683_v33 = vld [vmem:[#allocation5 + $0x1e8] sm:$0xff]  }
 0x207   : > { %v947_v37 = vpack.c.bf16 %v946_v35, %v945_v34 }
 0x209   : > { %3286 = vmatmul.mubr.bf16.vlgmr.msra.gmra.mxu0 %v947_v37 }
 0x20a   : > { %3310 = vmatpush3.bf16.msra.mxu0 %v3645_v36  ;;  %3325 = vmatprep.mubr.msk.bf16.mxu0 %vm3896_vm1, %v3894_v0 }
 0x20b   : > { %3311 = vmatprep.subr.bf16.mxu0 %v3894_v0 }
 0x20e   : > { %3312 = vmatpush3.bf16.msra.mxu0 %v3647_v38 }
 0x20f   : > { %3313 = vmatprep.subr.bf16.mxu0 %v3894_v0 }
 0x212   : > { %3314 = vmatpush3.bf16.msra.mxu0 %v3649_v40 }
 0x213   : > { %3315 = vmatprep.subr.bf16.mxu0 %v3894_v0 }
 0x216   : > { %3316 = vmatpush3.bf16.msra.mxu0 %v3651_v42 }
 0x217   : > { %3317 = vmatprep.subr.bf16.mxu0 %v3894_v0 }
 0x21a   : > { %3318 = vmatpush3.bf16.msra.mxu0 %v3653_v44 }
 0x21b   : > { %3319 = vmatprep.subr.bf16.mxu0 %v3894_v0 }
 0x21e   : > { %3320 = vmatpush3.bf16.msra.mxu0 %v3655_v46 }
 0x21f   : > { %3321 = vmatprep.subr.bf16.mxu0 %v3894_v0 }
 0x222   : > { %3322 = vmatpush3.bf16.msra.mxu0 %v3657_v48 }
 0x223   : > { %3323 = vmatprep.subr.bf16.mxu0 %v3894_v0 }
 0x226   : > { %3324 = vmatpush3.bf16.msra.mxu0 %v3659_v49 }
 0x227   : > { %3349 = vmatprep.subr.bf16.mxu0 %v3894_v0 }
 0x2c9   : > { %v1053_v51 = vpop.f32.mrf.mxu0 }
 0x2ca   : > { %v1054_v52 = vadd.f32 %v2858_v50, %v1053_v51 }
 0x2cb   : > { %v3287_v54 = vpop.f32.mrf.mxu0 }
 0x2cc   : > { %v1060_v56 = vadd.f32 %v1054_v52, %v4079_v27 }
 0x2cd   : > { %v1056_v55 = vpop.f32.mrf.mxu0 }
 0x2ce   : > { %v1057_v57 = vadd.f32 %v2858_v50, %v1056_v55  ;;  %v4142_v61 = vmul.f32 %v1060_v56, %v4135_v53  ;;  %v3682_v56 = vld [vmem:[#allocation5 + $0x1b8] sm:$0xff]  }
 0x2cf   : > { %v3288_v58 = vpop.f32.mrf.mxu0 }
 0x2d0   : > { %v1061_v59 = vadd.f32 %v1057_v57, %v4077_v26  ;;  %v3684_v58 = vld [vmem:[#allocation5 + $0x1b0] sm:$0xff]  }
 0x2d2   : > { %v4145_v62 = vmul.f32 %v1061_v59, %v4139_v60  ;;  %v3685_v59 = vld [vmem:[#allocation5 + $0x1e0] sm:$0xff]  }
 0x2d4   : > { %v3026_v63 = vpack.c.bf16 %v4145_v62, %v4142_v61 }
 0x2d6   : > { %3039 = vst [vmem:[#allocation2 + $0x8] sm:$0xff] %v3026_v63   ;;  %v3686_v63 = vld [vmem:[#allocation5 + $0x1a8] sm:$0xff]  }
 0x2dd   : > { %v1075_v3 = vld [vmem:[#allocation2 + $0x8] sm:$0xf]  ;;  %v1094_v27 = vld [vmem:[#allocation2 + $0xc] sm:$0xf] }
 0x2de   : > { %v2869_v4 = vcombine.low %v1075_v3, %v1094_v27  ;;  %v2878_v5 = vcombine.low %v1074_v1, %v1075_v3  ;;  %v3662_v6 = vld [vmem:[#allocation2 + $0xc] ss:$0 sps:$4 sm:$0x77]   ;;  %v3689_v3 = vld [vmem:[#allocation5 + $0x1d0] sm:$0xff]  }
 0x2df   : > { %v1215_v7 = vrot.slane %v3662_v6, 3  ;;  %v3670_v15 = vld [vmem:[#allocation2 + $0x8] sm:$0xfe]   ;;  %v3693_v6 = vld [vmem:[#allocation5 + $0x1c0] sm:$0xff]  }
 0x2e0   : > { %3306 = vmatmul.mubr.bf16.vlgmr.msra.gmra.mxu1 %v2869_v4  ;;  %v1214_v26 = vrot.slane %v2878_v5, 3  ;;  %v1336_v18 = vrot.slane %v3670_v15, 1  ;;  %v3687_v1 = vld [vmem:[#allocation5 + $0x1d8] sm:$0xff]   ;;  %v3691_v4 = vld [vmem:[#allocation5 + $0x1c8] sm:$0xff]   ;;  %v3692_v5 = vld [vmem:[#allocation5 + $0x190] sm:$0xff]  }
 0x2e1   : > { %3330 = vmatpush3.bf16.msra.mxu1 %v3660_v2  ;;  %3345 = vmatprep.mubr.msk.bf16.mxu1 %vm3896_vm1, %v3894_v0  ;;  %v3688_v2 = vld [vmem:[#allocation5 + $0x1a0] sm:$0xff]   ;;  %v3690_v27 = vld [vmem:[#allocation5 + $0x198] sm:$0xff]  }
 0x2e2   : > { %v1216_v9 = vsel %vm1213_vm4, %v1214_v26, %v1215_v7  ;;  %3331 = vmatprep.subr.bf16.mxu1 %v3894_v0  ;;  %v1338_v20 = vsel %vm1335_vm5, %v1336_v18, %v1337_v19  ;;  %v3694_v26 = vld [vmem:[#allocation5 + $0x188] sm:$0xff]   ;;  %v3696_v7 = vld [vmem:[#allocation5 + $0x180] sm:$0xff]  }
 0x2e3   : > { %3326 = vmatmul.mubr.bf16.vlgmr.msra.gmra.mxu0 %v1216_v9 }
 0x2e4   : > { %3365 = vmatprep.mubr.msk.bf16.mxu0 %vm3896_vm1, %v3894_v0  ;;  %3350 = vmatpush3.bf16.msra.mxu0 %v3672_v21  ;;  %v3697_v21 = vld [vmem:[#allocation5 + $0x238] sm:$0xff]  }
 0x2e5   : > { %3332 = vmatpush3.bf16.msra.mxu1 %v3663_v8  ;;  %3351 = vmatprep.subr.bf16.mxu0 %v3894_v0  ;;  %v2901_v8 = vld [vmem:[%s4322_s7 + $0x1] ss:$0 sm:$0xff] }
 0x2e6   : > { %3333 = vmatprep.subr.bf16.mxu1 %v3894_v0 }
 0x2e8   : > { %3352 = vmatpush3.bf16.msra.mxu0 %v3673_v22 }
 0x2e9   : > { %3334 = vmatpush3.bf16.msra.mxu1 %v3664_v10  ;;  %3353 = vmatprep.subr.bf16.mxu0 %v3894_v0 }
 0x2ea   : > { %3335 = vmatprep.subr.bf16.mxu1 %v3894_v0 }
 0x2ec   : > { %3354 = vmatpush3.bf16.msra.mxu0 %v3674_v23 }
 0x2ed   : > { %3336 = vmatpush3.bf16.msra.mxu1 %v3665_v11  ;;  %3355 = vmatprep.subr.bf16.mxu0 %v3894_v0 }
 0x2ee   : > { %3337 = vmatprep.subr.bf16.mxu1 %v3894_v0 }
 0x2f0   : > { %3356 = vmatpush3.bf16.msra.mxu0 %v3675_v24 }
 0x2f1   : > { %3338 = vmatpush3.bf16.msra.mxu1 %v3666_v12  ;;  %3357 = vmatprep.subr.bf16.mxu0 %v3894_v0 }
 0x2f2   : > { %3339 = vmatprep.subr.bf16.mxu1 %v3894_v0 }
 0x2f4   : > { %3358 = vmatpush3.bf16.msra.mxu0 %v3676_v25 }
 0x2f5   : > { %3340 = vmatpush3.bf16.msra.mxu1 %v3667_v13  ;;  %3359 = vmatprep.subr.bf16.mxu0 %v3894_v0 }
 0x2f6   : > { %3341 = vmatprep.subr.bf16.mxu1 %v3894_v0 }
 0x2f8   : > { %3360 = vmatpush3.bf16.msra.mxu0 %v3677_v28 }
 0x2f9   : > { %3342 = vmatpush3.bf16.msra.mxu1 %v3668_v14  ;;  %3361 = vmatprep.subr.bf16.mxu0 %v3894_v0 }
 0x2fa   : > { %3343 = vmatprep.subr.bf16.mxu1 %v3894_v0 }
 0x2fc   : > { %3362 = vmatpush3.bf16.msra.mxu0 %v3678_v29  ;;  %v3700_v29 = vld [vmem:[#allocation5 + $0x230] sm:$0xff]  }
 0x2fd   : > { %3344 = vmatpush3.bf16.msra.mxu1 %v3669_v17  ;;  %3363 = vmatprep.subr.bf16.mxu0 %v3894_v0 }
 0x2fe   : > { %3369 = vmatprep.subr.bf16.mxu1 %v3894_v0 }
 0x300   : > { %3346 = vmatmul.mubr.bf16.vlgmr.msra.gmra.mxu1 %v1338_v20  ;;  %3364 = vmatpush3.bf16.msra.mxu0 %v3679_v30  ;;  %v1572_v20 = vld [vmem:[#allocation2 + $0x4] sm:$0xc] }
 0x301   : > { %3385 = vmatprep.mubr.msk.bf16.mxu1 %vm3896_vm1, %v3894_v0  ;;  %3389 = vmatprep.subr.bf16.mxu0 %v3894_v0 }
 0x302   : > { %3370 = vmatpush3.bf16.msra.mxu1 %v3680_v31  ;;  %v3701_v31 = vld [vmem:[#allocation5 + $0x228] sm:$0xff]  }
 0x303   : > { %3371 = vmatprep.subr.bf16.mxu1 %v3894_v0 }
 0x306   : > { %3372 = vmatpush3.bf16.msra.mxu1 %v3681_v32  ;;  %v3702_v32 = vld [vmem:[#allocation5 + $0x220] sm:$0xff]  }
 0x307   : > { %3373 = vmatprep.subr.bf16.mxu1 %v3894_v0 }
 0x30a   : > { %3374 = vmatpush3.bf16.msra.mxu1 %v3683_v33  ;;  %v3703_v33 = vld [vmem:[#allocation5 + $0x218] sm:$0xff]  }
 0x30b   : > { %3375 = vmatprep.subr.bf16.mxu1 %v3894_v0 }
 0x30e   : > { %3376 = vmatpush3.bf16.msra.mxu1 %v3685_v59 }
 0x30f   : > { %3377 = vmatprep.subr.bf16.mxu1 %v3894_v0 }
 0x312   : > { %3378 = vmatpush3.bf16.msra.mxu1 %v3687_v1 }
 0x313   : > { %3379 = vmatprep.subr.bf16.mxu1 %v3894_v0 }
 0x316   : > { %3380 = vmatpush3.bf16.msra.mxu1 %v3689_v3 }
 0x317   : > { %3381 = vmatprep.subr.bf16.mxu1 %v3894_v0 }
 0x31a   : > { %3382 = vmatpush3.bf16.msra.mxu1 %v3691_v4  ;;  %v2942_v4 = vld [vmem:[%s4320_s5 + $0x2] ss:$0 sm:$0xff] }
 0x31b   : > { %3383 = vmatprep.subr.bf16.mxu1 %v3894_v0 }
 0x31e   : > { %3384 = vmatpush3.bf16.msra.mxu1 %v3693_v6 }
 0x31f   : > { %3409 = vmatprep.subr.bf16.mxu1 %v3894_v0 }
 0x3a0   : > { %v1200_v34 = vpop.f32.mrf.mxu1 }
 0x3a2   : > { %v3307_v35 = vpop.f32.mrf.mxu1 }
 0x3a3   : > { %v1300_v36 = vpop.f32.mrf.mxu0  ;;  %v3705_v35 = vld [vmem:[#allocation5 + $0x208] sm:$0xff]  }
 0x3a4   : > { %v1203_v37 = vpop.f32.mrf.mxu1  ;;  %v1301_v42 = vadd.f32 %v1300_v36, %v1200_v34  ;;  %v3704_v34 = vld [vmem:[#allocation5 + $0x210] sm:$0xff]  }
 0x3a5   : > { %v3327_v38 = vpop.f32.mrf.mxu0 }
 0x3a6   : > { %v3308_v39 = vpop.f32.mrf.mxu1  ;;  %v3706_v38 = vld [vmem:[#allocation5 + $0x200] sm:$0xff]  }
 0x3a7   : > { %v1303_v40 = vpop.f32.mrf.mxu0 }
 0x3a8   : > { %v1304_v47 = vadd.f32 %v1303_v40, %v1203_v37  ;;  %v3708_v37 = vld [vmem:[#allocation2 + $0x10] ss:$0 sps:$4 sm:$0x33]  }
 0x3a9   : > { %v3328_v41 = vpop.f32.mrf.mxu0  ;;  %v1834_v40 = vrot.slane %v3708_v37, 2 }
 0x3c0   : > { %v1422_v43 = vpop.f32.mrf.mxu1 }
 0x3c1   : > { %v1429_v44 = vadd.f32 %v1422_v43, %v1301_v42  ;;  %v3709_v42 = vld [vmem:[#allocation7 + $0xb8] sm:$0xff]   ;;  %v3710_v43 = vld [vmem:[#allocation7 + $0xb0] sm:$0xff]  }
 0x3c2   : > { %v3347_v46 = vpop.f32.mrf.mxu1 }
 0x3c3   : > { %v1439_v49 = vadd.f32 %v2899_v45, %v1429_v44  ;;  %v3711_v44 = vld [vmem:[#allocation7 + $0xa8] sm:$0xff]   ;;  %v3713_v46 = vld [vmem:[#allocation7 + $0x98] sm:$0xff]  }
 0x3c4   : > { %v1425_v48 = vpop.f32.mrf.mxu1 }
 0x3c5   : > { %v1430_v50 = vadd.f32 %v1425_v48, %v1304_v47  ;;  %v1441_v54 = vmax.f32 %v1439_v49, 0.0  ;;  %v3714_v47 = vld [vmem:[#allocation7 + $0x90] sm:$0xff]   ;;  %v3715_v48 = vld [vmem:[#allocation7 + $0x88] sm:$0xff]   ;;  %v3716_v49 = vld [vmem:[#allocation7 + $0x80] sm:$0xff]  }
 0x3c6   : > { %v3348_v51 = vpop.f32.mrf.mxu1 }
 0x3c7   : > { %v1440_v52 = vadd.f32 %v2899_v45, %v1430_v50  ;;  %v3712_v45 = vld [vmem:[#allocation7 + $0xa0] sm:$0xff]   ;;  %v3717_v50 = vld [vmem:[#allocation5 + $0x2b8] sm:$0xff]   ;;  %v3718_v51 = vld [vmem:[#allocation5 + $0x2b0] sm:$0xff]  }
 0x3c9   : > { %v1442_v55 = vmax.f32 %v1440_v52, 0.0  ;;  %v3719_v52 = vld [vmem:[#allocation5 + $0x2a8] sm:$0xff]  }
 0x3cb   : > { %v1443_v57 = vpack.c.bf16 %v1442_v55, %v1441_v54 }
 0x3cd   : > { %3366 = vmatmul.mubr.bf16.vlgmr.msra.gmra.mxu0 %v1443_v57 }
 0x3ce   : > { %3390 = vmatpush3.bf16.msra.mxu0 %v3682_v56  ;;  %3405 = vmatprep.mubr.msk.bf16.mxu0 %vm3896_vm1, %v3894_v0 }
 0x3cf   : > { %3391 = vmatprep.subr.bf16.mxu0 %v3894_v0 }
 0x3d2   : > { %3392 = vmatpush3.bf16.msra.mxu0 %v3684_v58 }
 0x3d3   : > { %3393 = vmatprep.subr.bf16.mxu0 %v3894_v0 }
 0x3d6   : > { %3394 = vmatpush3.bf16.msra.mxu0 %v3686_v63 }
 0x3d7   : > { %3395 = vmatprep.subr.bf16.mxu0 %v3894_v0 }
 0x3da   : > { %3396 = vmatpush3.bf16.msra.mxu0 %v3688_v2 }
 0x3db   : > { %3397 = vmatprep.subr.bf16.mxu0 %v3894_v0 }
 0x3de   : > { %3398 = vmatpush3.bf16.msra.mxu0 %v3690_v27 }
 0x3df   : > { %3399 = vmatprep.subr.bf16.mxu0 %v3894_v0 }
 0x3e2   : > { %3400 = vmatpush3.bf16.msra.mxu0 %v3692_v5 }
 0x3e3   : > { %3401 = vmatprep.subr.bf16.mxu0 %v3894_v0 }
 0x3e6   : > { %3402 = vmatpush3.bf16.msra.mxu0 %v3694_v26 }
 0x3e7   : > { %3403 = vmatprep.subr.bf16.mxu0 %v3894_v0 }
 0x3ea   : > { %3404 = vmatpush3.bf16.msra.mxu0 %v3696_v7 }
 0x3eb   : > { %3429 = vmatprep.subr.bf16.mxu0 %v3894_v0 }
 0x48d   : > { %v1551_v9 = vpop.f32.mrf.mxu0 }
 0x48e   : > { %v1552_v10 = vadd.f32 %v2901_v8, %v1551_v9 }
 0x48f   : > { %v3367_v11 = vpop.f32.mrf.mxu0 }
 0x490   : > { %v1558_v13 = vadd.f32 %v1552_v10, %v4142_v61 }
 0x491   : > { %v1554_v12 = vpop.f32.mrf.mxu0 }
 0x492   : > { %v1555_v14 = vadd.f32 %v2901_v8, %v1554_v12  ;;  %v4198_v17 = vmul.f32 %v1558_v13, %v4135_v53  ;;  %v3720_v13 = vld [vmem:[#allocation5 + $0x278] sm:$0xff]  }
 0x493   : > { %v3368_v15 = vpop.f32.mrf.mxu0 }
 0x494   : > { %v1559_v16 = vadd.f32 %v1555_v14, %v4145_v62  ;;  %v3721_v15 = vld [vmem:[#allocation5 + $0x2a0] sm:$0xff]  }
 0x496   : > { %v4201_v18 = vmul.f32 %v1559_v16, %v4139_v60  ;;  %v3722_v16 = vld [vmem:[#allocation5 + $0x270] sm:$0xff]  }
 0x498   : > { %v3031_v19 = vpack.c.bf16 %v4201_v18, %v4198_v17 }
 0x49a   : > { %3040 = vst [vmem:[#allocation2 + $0x8] sm:$0xff] %v3031_v19   ;;  %v3723_v19 = vld [vmem:[#allocation5 + $0x298] sm:$0xff]  }
 0x4a1   : > { %v1573_v22 = vld [vmem:[#allocation2 + $0x8] sm:$0xf]  ;;  %v1592_v23 = vld [vmem:[#allocation2 + $0xc] sm:$0xf] }
 0x4a2   : > { %v2912_v24 = vcombine.low %v1573_v22, %v1592_v23  ;;  %v2921_v61 = vcombine.low %v1572_v20, %v1573_v22  ;;  %v3699_v25 = vld [vmem:[#allocation2 + $0xc] ss:$0 sps:$4 sm:$0x33]   ;;  %v3724_v20 = vld [vmem:[#allocation5 + $0x268] sm:$0xff]   ;;  %v3726_v22 = vld [vmem:[#allocation5 + $0x260] sm:$0xff]  }
 0x4a3   : > { %v1713_v28 = vrot.slane %v3699_v25, 2  ;;  %v3707_v36 = vld [vmem:[#allocation2 + $0x8] sm:$0xfc]   ;;  %v3727_v23 = vld [vmem:[#allocation5 + $0x288] sm:$0xff]   ;;  %v3730_v25 = vld [vmem:[#allocation5 + $0x250] sm:$0xff]  }
 0x4a4   : > { %3386 = vmatmul.mubr.bf16.vlgmr.msra.gmra.mxu1 %v2912_v24  ;;  %v1712_v62 = vrot.slane %v2921_v61, 2  ;;  %v1833_v39 = vrot.slane %v3707_v36, 2  ;;  %v3728_v24 = vld [vmem:[#allocation5 + $0x258] sm:$0xff]   ;;  %v3729_v61 = vld [vmem:[#allocation5 + $0x280] sm:$0xff]  }
 0x4a5   : > { %3410 = vmatpush3.bf16.msra.mxu1 %v3697_v21  ;;  %3425 = vmatprep.mubr.msk.bf16.mxu1 %vm3896_vm1, %v3894_v0  ;;  %v3725_v21 = vld [vmem:[#allocation5 + $0x290] sm:$0xff]  }
 0x4a6   : > { %v1714_v30 = vsel %vm1711_vm6, %v1712_v62, %v1713_v28  ;;  %3411 = vmatprep.subr.bf16.mxu1 %v3894_v0  ;;  %v1835_v41 = vsel %vm1711_vm6, %v1833_v39, %v1834_v40  ;;  %v3733_v62 = vld [vmem:[#allocation5 + $0x248] sm:$0xff]   ;;  %v3735_v28 = vld [vmem:[#allocation5 + $0x240] sm:$0xff]  }
 0x4a7   : > { %3406 = vmatmul.mubr.bf16.vlgmr.msra.gmra.mxu0 %v1714_v30 }
 0x4a8   : > { %3445 = vmatprep.mubr.msk.bf16.mxu0 %vm3896_vm1, %v3894_v0  ;;  %3430 = vmatpush3.bf16.msra.mxu0 %v3709_v42  ;;  %v3734_v42 = vld [vmem:[#allocation5 + $0x2f8] sm:$0xff]  }
 0x4a9   : > { %3412 = vmatpush3.bf16.msra.mxu1 %v3700_v29  ;;  %3431 = vmatprep.subr.bf16.mxu0 %v3894_v0  ;;  %v2944_v29 = vld [vmem:[%s4322_s7 + $0x2] ss:$0 sm:$0xff] }
 0x4aa   : > { %3413 = vmatprep.subr.bf16.mxu1 %v3894_v0 }
 0x4ac   : > { %3432 = vmatpush3.bf16.msra.mxu0 %v3710_v43 }
 0x4ad   : > { %3414 = vmatpush3.bf16.msra.mxu1 %v3701_v31  ;;  %3433 = vmatprep.subr.bf16.mxu0 %v3894_v0 }
 0x4ae   : > { %3415 = vmatprep.subr.bf16.mxu1 %v3894_v0 }
 0x4b0   : > { %3434 = vmatpush3.bf16.msra.mxu0 %v3711_v44 }
 0x4b1   : > { %3416 = vmatpush3.bf16.msra.mxu1 %v3702_v32  ;;  %3435 = vmatprep.subr.bf16.mxu0 %v3894_v0 }
 0x4b2   : > { %3417 = vmatprep.subr.bf16.mxu1 %v3894_v0 }
 0x4b4   : > { %3436 = vmatpush3.bf16.msra.mxu0 %v3712_v45 }
 0x4b5   : > { %3418 = vmatpush3.bf16.msra.mxu1 %v3703_v33  ;;  %3437 = vmatprep.subr.bf16.mxu0 %v3894_v0 }
 0x4b6   : > { %3419 = vmatprep.subr.bf16.mxu1 %v3894_v0 }
 0x4b8   : > { %3438 = vmatpush3.bf16.msra.mxu0 %v3713_v46 }
 0x4b9   : > { %3420 = vmatpush3.bf16.msra.mxu1 %v3704_v34  ;;  %3439 = vmatprep.subr.bf16.mxu0 %v3894_v0 }
 0x4ba   : > { %3421 = vmatprep.subr.bf16.mxu1 %v3894_v0 }
 0x4bc   : > { %3440 = vmatpush3.bf16.msra.mxu0 %v3714_v47 }
 0x4bd   : > { %3422 = vmatpush3.bf16.msra.mxu1 %v3705_v35  ;;  %3441 = vmatprep.subr.bf16.mxu0 %v3894_v0 }
 0x4be   : > { %3423 = vmatprep.subr.bf16.mxu1 %v3894_v0 }
 0x4c0   : > { %3442 = vmatpush3.bf16.msra.mxu0 %v3715_v48  ;;  %v3736_v48 = vld [vmem:[#allocation5 + $0x2f0] sm:$0xff]  }
 0x4c1   : > { %3424 = vmatpush3.bf16.msra.mxu1 %v3706_v38  ;;  %3443 = vmatprep.subr.bf16.mxu0 %v3894_v0 }
 0x4c2   : > { %3449 = vmatprep.subr.bf16.mxu1 %v3894_v0 }
 0x4c4   : > { %3426 = vmatmul.mubr.bf16.vlgmr.msra.gmra.mxu1 %v1835_v41  ;;  %3444 = vmatpush3.bf16.msra.mxu0 %v3716_v49  ;;  %v2069_v41 = vld [vmem:[#allocation2 + $0x4] sm:$0xf] }
 0x4c5   : > { %3465 = vmatprep.mubr.msk.bf16.mxu1 %vm3896_vm1, %v3894_v0  ;;  %3469 = vmatprep.subr.bf16.mxu0 %v3894_v0 }
 0x4c6   : > { %3450 = vmatpush3.bf16.msra.mxu1 %v3717_v50 }
 0x4c7   : > { %3451 = vmatprep.subr.bf16.mxu1 %v3894_v0 }
 0x4ca   : > { %3452 = vmatpush3.bf16.msra.mxu1 %v3718_v51 }
 0x4cb   : > { %3453 = vmatprep.subr.bf16.mxu1 %v3894_v0 }
 0x4ce   : > { %3454 = vmatpush3.bf16.msra.mxu1 %v3719_v52 }
 0x4cf   : > { %3455 = vmatprep.subr.bf16.mxu1 %v3894_v0 }
 0x4d2   : > { %3456 = vmatpush3.bf16.msra.mxu1 %v3721_v15  ;;  %v3749_v15 = vld [vmem:[#allocation7 + $0xe0] sm:$0xff]  }
 0x4d3   : > { %3457 = vmatprep.subr.bf16.mxu1 %v3894_v0 }
 0x4d6   : > { %3458 = vmatpush3.bf16.msra.mxu1 %v3723_v19  ;;  %v3751_v19 = vld [vmem:[#allocation7 + $0xd0] sm:$0xff]  }
 0x4d7   : > { %3459 = vmatprep.subr.bf16.mxu1 %v3894_v0 }
 0x4da   : > { %3460 = vmatpush3.bf16.msra.mxu1 %v3725_v21  ;;  %v3753_v21 = vld [vmem:[#allocation7 + $0xc0] sm:$0xff]  }
 0x4db   : > { %3461 = vmatprep.subr.bf16.mxu1 %v3894_v0 }
 0x4de   : > { %3462 = vmatpush3.bf16.msra.mxu1 %v3727_v23  ;;  %v3755_v23 = vld [vmem:[#allocation8 + $0x30] sm:$0xff]  }
 0x4df   : > { %3463 = vmatprep.subr.bf16.mxu1 %v3894_v0 }
 0x4e2   : > { %3464 = vmatpush3.bf16.msra.mxu1 %v3729_v61  ;;  %v3757_v61 = vld [vmem:[#allocation8 + $0x20] sm:$0xff]  }
 0x4e3   : > { %3489 = vmatprep.subr.bf16.mxu1 %v3894_v0 }
 0x564   : > { %v1698_v54 = vpop.f32.mrf.mxu1 }
 0x566   : > { %v3387_v55 = vpop.f32.mrf.mxu1 }
 0x567   : > { %v1798_v56 = vpop.f32.mrf.mxu0 }
 0x568   : > { %v1701_v57 = vpop.f32.mrf.mxu1  ;;  %v1799_v2 = vadd.f32 %v1798_v56, %v1698_v54  ;;  %v3738_v54 = vld [vmem:[#allocation5 + $0x2e8] sm:$0xff]   ;;  %v3739_v56 = vld [vmem:[#allocation5 + $0x2e0] sm:$0xff]  }
 0x569   : > { %v3407_v58 = vpop.f32.mrf.mxu0 }
 0x56a   : > { %v3388_v59 = vpop.f32.mrf.mxu1 }
 0x56b   : > { %v1801_v63 = vpop.f32.mrf.mxu0  ;;  %v3745_v59 = vld [vmem:[#allocation2 + $0x10] ss:$0 sps:$4 sm:$0xff]  }
 0x56c   : > { %v1802_v6 = vadd.f32 %v1801_v63, %v1701_v57  ;;  %v3740_v57 = vld [vmem:[#allocation5 + $0x2d8] sm:$0xff]   ;;  %v3741_v63 = vld [vmem:[#allocation5 + $0x2d0] sm:$0xff]  }
 0x56d   : > { %v3408_v1 = vpop.f32.mrf.mxu0 }
 0x584   : > { %v1919_v3 = vpop.f32.mrf.mxu1 }
 0x585   : > { %v1926_v27 = vadd.f32 %v1919_v3, %v1799_v2  ;;  %v2347_v3 = vshrl.u32 %v3745_v59, 16 }
 0x586   : > { %v3427_v5 = vpop.f32.mrf.mxu1 }
 0x587   : > { %v1936_v7 = vadd.f32 %v2942_v4, %v1926_v27  ;;  %v2350_v27 = vshll.u32 %v3745_v59, 16 }
 0x588   : > { %v1922_v26 = vpop.f32.mrf.mxu1 }
 0x589   : > { %v1927_v8 = vadd.f32 %v1922_v26, %v1802_v6  ;;  %v1938_v11 = vmax.f32 %v1936_v7, 0.0  ;;  %v2349_v26 = vrot.slane %v2347_v3, 3  ;;  %v2352_v7 = vrot.slane %v2350_v27, 4  ;;  %v2996_v27 = vld [vmem:[%s4324_s9] ss:$0 sm:$0xff] }
 0x58a   : > { %v3428_v9 = vpop.f32.mrf.mxu1 }
 0x58b   : > { %v1937_v10 = vadd.f32 %v2942_v4, %v1927_v8  ;;  %v3742_v4 = vld [vmem:[#allocation5 + $0x2c8] sm:$0xff]   ;;  %v3743_v8 = vld [vmem:[#allocation5 + $0x2c0] sm:$0xff]  }
 0x58d   : > { %v1939_v12 = vmax.f32 %v1937_v10, 0.0  ;;  %v2353_v10 = vor.u32 %v2352_v7, %v2349_v26 }
 0x58f   : > { %v1940_v14 = vpack.c.bf16 %v1939_v12, %v1938_v11  ;;  %v3746_v12 = vld [vmem:[#allocation7 + $0xf8] sm:$0xff]  }
 0x591   : > { %3446 = vmatmul.mubr.bf16.vlgmr.msra.gmra.mxu0 %v1940_v14  ;;  %v3748_v14 = vld [vmem:[#allocation7 + $0xe8] sm:$0xff]  }
 0x592   : > { %3470 = vmatpush3.bf16.msra.mxu0 %v3720_v13  ;;  %3485 = vmatprep.mubr.msk.bf16.mxu0 %vm3896_vm1, %v3894_v0  ;;  %v3747_v13 = vld [vmem:[#allocation7 + $0xf0] sm:$0xff]  }
 0x593   : > { %3471 = vmatprep.subr.bf16.mxu0 %v3894_v0 }
 0x596   : > { %3472 = vmatpush3.bf16.msra.mxu0 %v3722_v16  ;;  %v3750_v16 = vld [vmem:[#allocation7 + $0xd8] sm:$0xff]  }
 0x597   : > { %3473 = vmatprep.subr.bf16.mxu0 %v3894_v0 }
 0x59a   : > { %3474 = vmatpush3.bf16.msra.mxu0 %v3724_v20  ;;  %v3752_v20 = vld [vmem:[#allocation7 + $0xc8] sm:$0xff]  }
 0x59b   : > { %3475 = vmatprep.subr.bf16.mxu0 %v3894_v0 }
 0x59e   : > { %3476 = vmatpush3.bf16.msra.mxu0 %v3726_v22  ;;  %v3754_v22 = vld [vmem:[#allocation8 + $0x38] sm:$0xff]  }
 0x59f   : > { %3477 = vmatprep.subr.bf16.mxu0 %v3894_v0 }
 0x5a2   : > { %3478 = vmatpush3.bf16.msra.mxu0 %v3728_v24  ;;  %v3756_v24 = vld [vmem:[#allocation8 + $0x28] sm:$0xff]  }
 0x5a3   : > { %3479 = vmatprep.subr.bf16.mxu0 %v3894_v0 }
 0x5a6   : > { %3480 = vmatpush3.bf16.msra.mxu0 %v3730_v25  ;;  %v3758_v25 = vld [vmem:[#allocation8 + $0x18] sm:$0xff]  }
 0x5a7   : > { %3481 = vmatprep.subr.bf16.mxu0 %v3894_v0 }
 0x5aa   : > { %3482 = vmatpush3.bf16.msra.mxu0 %v3733_v62 }
 0x5ab   : > { %3483 = vmatprep.subr.bf16.mxu0 %v3894_v0 }
 0x5ae   : > { %3484 = vmatpush3.bf16.msra.mxu0 %v3735_v28 }
 0x5af   : > { %3509 = vmatprep.subr.bf16.mxu0 %v3894_v0 }
 0x651   : > { %v2048_v30 = vpop.f32.mrf.mxu0 }
 0x652   : > { %v2049_v31 = vadd.f32 %v2944_v29, %v2048_v30 }
 0x653   : > { %v3447_v32 = vpop.f32.mrf.mxu0 }
 0x654   : > { %v2055_v34 = vadd.f32 %v2049_v31, %v4198_v17 }
 0x655   : > { %v2051_v33 = vpop.f32.mrf.mxu0 }
 0x656   : > { %v2052_v35 = vadd.f32 %v2944_v29, %v2051_v33  ;;  %v4256_v38 = vmul.f32 %v2055_v34, %v4135_v53 }
 0x657   : > { %v3448_v36 = vpop.f32.mrf.mxu0 }
 0x658   : > { %v2056_v37 = vadd.f32 %v2052_v35, %v4201_v18 }
 0x65a   : > { %v4259_v39 = vmul.f32 %v2056_v37, %v4139_v60 }
 0x65c   : > { %v3036_v40 = vpack.c.bf16 %v4259_v39, %v4256_v38 }
 0x65e   : > { %3041 = vst [vmem:[#allocation2 + $0x8] sm:$0xff] %v3036_v40   ;;  %v2985_v40 = vld [vmem:[%s4320_s5 + $0x3] ss:$0 sm:$0xff] }
 0x665   : > { %v2070_v43 = vld [vmem:[#allocation2 + $0x8] sm:$0xf]  ;;  %v2089_v44 = vld [vmem:[#allocation2 + $0xc] sm:$0xf] }
 0x666   : > { %v2955_v45 = vcombine.low %v2070_v43, %v2089_v44  ;;  %v2964_v17 = vcombine.low %v2069_v41, %v2070_v43  ;;  %v3737_v46 = vld [vmem:[#allocation2 + $0xc] ss:$0 sps:$4 sm:$0x11]  }
 0x667   : > { %v2216_v18 = vshll.u32 %v3737_v46, 16  ;;  %v3744_v58 = vld [vmem:[#allocation2 + $0x8] sm:$0xf8]  }
 0x668   : > { %3466 = vmatmul.mubr.bf16.vlgmr.msra.gmra.mxu1 %v2955_v45  ;;  %v2211_v47 = vshll.u32 %v2964_v17, 16  ;;  %v2209_v49 = vshrl.u32 %v2964_v17, 16  ;;  %v2339_v1 = vshrl.u32 %v3744_v58, 16  ;;  %v2342_v2 = vshll.u32 %v3744_v58, 16 }
 0x669   : > { %3490 = vmatpush3.bf16.msra.mxu1 %v3734_v42  ;;  %3505 = vmatprep.mubr.msk.bf16.mxu1 %vm3896_vm1, %v3894_v0  ;;  %v2218_v52 = vrot.slane %v2216_v18, 1 }
 0x66a   : > { %3491 = vmatprep.subr.bf16.mxu1 %v3894_v0  ;;  %v2213_v50 = vrot.slane %v2211_v47, 1  ;;  %v2341_v5 = vrot.slane %v2339_v1, 3  ;;  %v2344_v6 = vrot.slane %v2342_v2, 4 }
 0x66c   : > { %v2214_v51 = vor.u32 %v2213_v50, %v2209_v49  ;;  %v2345_v9 = vor.u32 %v2344_v6, %v2341_v5  ;;  %v3759_v49 = vld [vmem:[#allocation8 + $0x10] sm:$0xff]   ;;  %v3760_v50 = vld [vmem:[#allocation8 + $0x8] sm:$0xff]  }
 0x66d   : > { %3492 = vmatpush3.bf16.msra.mxu1 %v3736_v48 }
 0x66e   : > { %v2219_v55 = vsel %vm831_vm3, %v2214_v51, %v2218_v52  ;;  %3493 = vmatprep.subr.bf16.mxu1 %v3894_v0  ;;  %v2354_v11 = vsel %vm695_vm2, %v2345_v9, %v2353_v10  ;;  %v3761_v51 = vld [vmem:[#allocation8] sm:$0xff]   ;;  %v2987_v52 = vld [vmem:[%s4322_s7 + $0x3] ss:$0 sm:$0xff] }
 0x66f   : > { %3486 = vmatmul.mubr.bf16.vlgmr.msra.gmra.mxu0 %v2219_v55 }
 0x670   : > { %3525 = vmatprep.mubr.msk.bf16.mxu0 %vm3896_vm1, %v3894_v0  ;;  %3510 = vmatpush3.bf16.msra.mxu0 %v3746_v12 }
 0x671   : > { %3494 = vmatpush3.bf16.msra.mxu1 %v3738_v54  ;;  %3511 = vmatprep.subr.bf16.mxu0 %v3894_v0 }
 0x672   : > { %3495 = vmatprep.subr.bf16.mxu1 %v3894_v0 }
 0x674   : > { %3512 = vmatpush3.bf16.msra.mxu0 %v3747_v13 }
 0x675   : > { %3496 = vmatpush3.bf16.msra.mxu1 %v3739_v56  ;;  %3513 = vmatprep.subr.bf16.mxu0 %v3894_v0 }
 0x676   : > { %3497 = vmatprep.subr.bf16.mxu1 %v3894_v0 }
 0x678   : > { %3514 = vmatpush3.bf16.msra.mxu0 %v3748_v14 }
 0x679   : > { %3498 = vmatpush3.bf16.msra.mxu1 %v3740_v57  ;;  %3515 = vmatprep.subr.bf16.mxu0 %v3894_v0 }
 0x67a   : > { %3499 = vmatprep.subr.bf16.mxu1 %v3894_v0 }
 0x67c   : > { %3516 = vmatpush3.bf16.msra.mxu0 %v3749_v15 }
 0x67d   : > { %3500 = vmatpush3.bf16.msra.mxu1 %v3741_v63  ;;  %3517 = vmatprep.subr.bf16.mxu0 %v3894_v0 }
 0x67e   : > { %3501 = vmatprep.subr.bf16.mxu1 %v3894_v0 }
 0x680   : > { %3518 = vmatpush3.bf16.msra.mxu0 %v3750_v16 }
 0x681   : > { %3502 = vmatpush3.bf16.msra.mxu1 %v3742_v4  ;;  %3519 = vmatprep.subr.bf16.mxu0 %v3894_v0 }
 0x682   : > { %3503 = vmatprep.subr.bf16.mxu1 %v3894_v0 }
 0x684   : > { %3520 = vmatpush3.bf16.msra.mxu0 %v3751_v19 }
 0x685   : > { %3504 = vmatpush3.bf16.msra.mxu1 %v3743_v8  ;;  %3521 = vmatprep.subr.bf16.mxu0 %v3894_v0 }
 0x686   : > { %3529 = vmatprep.subr.bf16.mxu1 %v3894_v0 }
 0x688   : > { %3506 = vmatmul.mubr.bf16.vlgmr.msra.gmra.mxu1 %v2354_v11  ;;  %3522 = vmatpush3.bf16.msra.mxu0 %v3752_v20 }
 0x689   : > { %3545 = vmatprep.mubr.msk.bf16.mxu1 %vm3896_vm1, %v3894_v0  ;;  %3523 = vmatprep.subr.bf16.mxu0 %v3894_v0 }
 0x68a   : > { %3530 = vmatpush3.bf16.msra.mxu1 %v3754_v22 }
 0x68b   : > { %3531 = vmatprep.subr.bf16.mxu1 %v3894_v0 }
 0x68c   : > { %3524 = vmatpush3.bf16.msra.mxu0 %v3753_v21 }
 0x68e   : > { %3532 = vmatpush3.bf16.msra.mxu1 %v3755_v23 }
 0x68f   : > { %3533 = vmatprep.subr.bf16.mxu1 %v3894_v0 }
 0x692   : > { %3534 = vmatpush3.bf16.msra.mxu1 %v3756_v24 }
 0x693   : > { %3535 = vmatprep.subr.bf16.mxu1 %v3894_v0 }
 0x696   : > { %3536 = vmatpush3.bf16.msra.mxu1 %v3757_v61 }
 0x697   : > { %3537 = vmatprep.subr.bf16.mxu1 %v3894_v0 }
 0x69a   : > { %3538 = vmatpush3.bf16.msra.mxu1 %v3758_v25 }
 0x69b   : > { %3539 = vmatprep.subr.bf16.mxu1 %v3894_v0 }
 0x69e   : > { %3540 = vmatpush3.bf16.msra.mxu1 %v3759_v49 }
 0x69f   : > { %3541 = vmatprep.subr.bf16.mxu1 %v3894_v0 }
 0x6a2   : > { %3542 = vmatpush3.bf16.msra.mxu1 %v3760_v50 }
 0x6a3   : > { %3543 = vmatprep.subr.bf16.mxu1 %v3894_v0 }
 0x6a6   : > { %3544 = vmatpush3.bf16.msra.mxu1 %v3761_v51 }
 0x728   : > { %v2195_v62 = vpop.f32.mrf.mxu1 }
 0x72a   : > { %v3467_v28 = vpop.f32.mrf.mxu1 }
 0x72c   : > { %v2198_v29 = vpop.f32.mrf.mxu1 }
 0x72e   : > { %v3468_v30 = vpop.f32.mrf.mxu1 }
 0x72f   : > { %v2303_v31 = vpop.f32.mrf.mxu0 }
 0x730   : > { %v2304_v35 = vadd.f32 %v2303_v31, %v2195_v62 }
 0x731   : > { %v3487_v32 = vpop.f32.mrf.mxu0 }
 0x733   : > { %v2306_v33 = vpop.f32.mrf.mxu0 }
 0x734   : > { %v2307_v42 = vadd.f32 %v2306_v33, %v2198_v29 }
 0x735   : > { %v3488_v34 = vpop.f32.mrf.mxu0 }
 0x748   : > { %v2438_v36 = vpop.f32.mrf.mxu1 }
 0x749   : > { %v2445_v37 = vadd.f32 %v2438_v36, %v2304_v35 }
 0x74a   : > { %v3507_v41 = vpop.f32.mrf.mxu1 }
 0x74b   : > { %v2455_v44 = vadd.f32 %v2985_v40, %v2445_v37 }
 0x74c   : > { %v2441_v43 = vpop.f32.mrf.mxu1 }
 0x74d   : > { %v2446_v45 = vadd.f32 %v2441_v43, %v2307_v42  ;;  %v2457_v47 = vmax.f32 %v2455_v44, 0.0 }
 0x74e   : > { %v3508_v17 = vpop.f32.mrf.mxu1 }
 0x74f   : > { %v2456_v46 = vadd.f32 %v2985_v40, %v2446_v45 }
 0x751   : > { %v2458_v18 = vmax.f32 %v2456_v46, 0.0 }
 0x753   : > { %v2459_v48 = vpack.c.bf16 %v2458_v18, %v2457_v47 }
 0x755   : > { %3526 = vmatmul.mubr.bf16.vlgmr.msra.gmra.mxu0 %v2459_v48 }
 0x815   : > { %v2567_v54 = vpop.f32.mrf.mxu0 }
 0x816   : > { %v2568_v55 = vadd.f32 %v2987_v52, %v2567_v54 }
 0x817   : > { %v3527_v56 = vpop.f32.mrf.mxu0 }
 0x818   : > { %v2574_v58 = vadd.f32 %v2568_v55, %v4256_v38 }
 0x819   : > { %v2570_v57 = vpop.f32.mrf.mxu0 }
 0x81a   : > { %v2571_v59 = vadd.f32 %v2987_v52, %v2570_v57  ;;  %v2576_v2 = vmul.f32 %v2574_v58, %v4135_v53 }
 0x81b   : > { %v3528_v63 = vpop.f32.mrf.mxu0 }
 0x81c   : > { %v2575_v1 = vadd.f32 %v2571_v59, %v4259_v39 }
 0x81e   : > { %v2577_v0 = vmul.f32 %v2575_v1, %v4139_v60 }
 0x820   : > { %v2578_v3 = vpack.c.bf16 %v2577_v0, %v2576_v2 }
 0x822   : > { %3546 = vmatmul.mubr.bf16.vlgmr.msra.gmra.mxu1 %v2578_v3 }
 0x8e2   : > { %v2684_v4 = vpop.f32.mrf.mxu1 }
 0x8e3   : > { %v2685_v5 = vadd.f32 %v2996_v27, %v2684_v4 }
 0x8e4   : > { %v3547_v38 = vpop.f32.mrf.mxu1 }
 0x8e5   : > { %v2691_v39 = vmul.f32 %v2685_v5, %v4135_v53 }
 0x8e6   : > { %v2687_v6 = vpop.f32.mrf.mxu1 }
 0x8e7   : > { %2694 = vst.msk [vmem:[%s438_s14] sm:$0xff] %vm2693_vm7, %v2691_v39  ;;  %v2688_v26 = vadd.f32 %v2996_v27, %v2687_v6 }
 0x8e8   : > { %v3548_v7 = vpop.f32.mrf.mxu1 }
 0x8e9   : > { %v2692_v8 = vmul.f32 %v2688_v26, %v4139_v60 }
 0x8eb   : > { %2695 = vst.msk [vmem:[%s438_s14 + $0x8] sm:$0xff] %vm2693_vm7, %v2692_v8 }
 0x8ec PF: > { %s23_s13 = sadd.s32 1, %s3884_s13  }
 0x8ed   : > { %p20_p2 = scmp.ge.s32.totalorder %s23_s13, 4  }
 0x8ef   :  { %22 = sbr.rel (!%p20_p2) target bundleno = 3 (0x3), region = 130 }
 0x8f4   :  { %2717 = vsyncpa [#allocation4], 1 }
 0x8f5   :  { %2719 = vsyncpa [#allocation4 + $0x1], 1 }
 0x8f6   :  { %2720 = vsyncpa [#allocation6], 1 }
 0x8f7   :  { %2721 = vsyncpa [#allocation9], 1 }

</bundles_post_ra>
